<compile_context>
chip_gen: v5e
topology: v5e:2x2
jax: 0.10.0
libtpu: 0.0.40
codegen_flags: <defaults>
</compile_context>

<pallas_src>
import functools

import jax
import jax.numpy as jnp
from jax import lax
from jax.experimental import pallas as pl
from jax.experimental.pallas import tpu as pltpu

B, N, C = 2, 16, 32
CLUSTER_NUM = 4
K_NEIGHBORS = 5


def _ctm_fused_kernel(x_ref, w_ref, noise_ref, it_ref, agg_ref, b_ref,
                      xm_ref, itn_ref, agg_out_ref, *,
                      cluster_num, k_neighbors, k_pad):
    f32 = jnp.float32
    BIG = f32(1e30)

    x = x_ref[...]                                        # [1, N, C] f32
    Bb, Nn, Cc = x.shape
    inv_sqrt_c = f32(1.0 / (float(Cc) ** 0.5))

    # iotas (int32; cast to f32 where a float compare is wanted)
    row_iota = lax.broadcasted_iota(jnp.int32, (Bb, Nn, Nn), 1)   # sublane index i
    col_iota = lax.broadcasted_iota(jnp.int32, (Bb, Nn, Nn), 2)   # lane index j
    eye = row_iota == col_iota
    sub_iota_f = lax.broadcasted_iota(jnp.int32, (Bb, Nn, 1), 1).astype(f32)
    lane_iota_f = lax.broadcasted_iota(jnp.int32, (Bb, 1, Nn), 2).astype(f32)
    kpad_iota = lax.broadcasted_iota(jnp.int32, (Bb, Nn, k_pad), 2)

    # ---------------- pairwise SQUARED distance d2[i,j] = ||x_i - x_j||^2 ------
    gram = jnp.einsum('bnc,bmc->bnm', x, x,
                      preferred_element_type=f32)          # [1, N, N] (MXU)
    sq_col = jnp.sum(x * x, axis=-1, keepdims=True)        # [1, N, 1]  VPU, exact
    # row-layout copy of ||x||^2 via diagonal mask + sublane reduce (no transpose)
    sq_row = jnp.sum(jnp.where(eye, sq_col, 0.0),
                     axis=-2, keepdims=True)               # [1, 1, N]
    d2 = jnp.maximum(sq_col + sq_row - 2.0 * gram, 0.0)
    d2 = jnp.where(eye, 0.0, d2)                           # exact-zero diagonal (matches cdist)
    d2_max = jnp.max(jnp.max(d2, axis=-2, keepdims=True),
                     axis=-1, keepdims=True)               # [1, 1, 1]

    # ---------------- k-NN local density (squared-distance domain) -------------
    # NOTE: masks ALL entries equal to the running minimum each step; identical
    # to torch.topk(largest=False) except on exact duplicate off-diagonal
    # distances (measure zero for generic float inputs).
    d_work = d2
    acc = jnp.zeros((Bb, Nn, 1), f32)
    for _ in range(k_neighbors):
        m = jnp.min(d_work, axis=-1, keepdims=True)        # [1, N, 1]
        acc = acc + m                                      # already squared
        d_work = jnp.where(d_work == m, BIG, d_work)
    density_col = (jnp.exp(-(acc * f32(1.0 / (k_neighbors * float(Cc)))))
                   + noise_ref[...] * f32(1e-6))           # [1, N, 1]
    density_row = jnp.sum(jnp.where(eye, density_col, 0.0),
                          axis=-2, keepdims=True)          # [1, 1, N]

    # ------- distance to nearest strictly-higher-density token, DPC score ------
    # Built directly in lane (row) layout: element (i, j) compares dens[i] > dens[j];
    # reducing over sublanes (i) gives, per token j, min dist to higher-density tokens.
    hi_t = density_col > density_row                       # [1, N, N] bool
    masked2 = jnp.where(hi_t, d2, d2_max)
    dmin2_row = jnp.min(masked2, axis=-2, keepdims=True)   # [1, 1, N]
    score_row = jnp.sqrt(dmin2_row) * inv_sqrt_c * density_row   # only O(N) sqrt

    # ---------------- token weight = exp(Linear(x)) (VPU reduce, no MXU) --------
    ts = jnp.sum(x * w_ref[...], axis=-1, keepdims=True) + b_ref[0]   # [1, N, 1]
    tw_col = jnp.exp(ts)

    # -------- cluster centers (top-k score); build center one-hot ---------------
    score_work = score_row
    coh = jnp.zeros((Bb, Nn, k_pad), f32)                  # center one-hot [1,N,Kpad]
    firsts = []
    for c in range(cluster_num):
        mx = jnp.max(score_work, axis=-1, keepdims=True)            # [1, 1, 1]
        cand = jnp.where(score_work == mx, lane_iota_f, f32(Nn))
        first = jnp.min(cand, axis=-1, keepdims=True)               # center token idx (f32)
        firsts.append(first)
        score_work = jnp.where(lane_iota_f == first, -BIG, score_work)
        coh = coh + jnp.where((sub_iota_f == first) & (kpad_iota == c), 1.0, 0.0)

    # -------- token -> center assignment: ONE contraction + lane argmin ---------
    d2c = jnp.einsum('bnm,bmk->bnk', d2, coh,
                     preferred_element_type=f32)           # [1, N, Kpad] (MXU)
    d2c = jnp.where(kpad_iota < cluster_num, d2c, BIG)     # padded columns never win
    mn = jnp.min(d2c, axis=-1, keepdims=True)
    cand_c = jnp.where(d2c == mn, kpad_iota.astype(f32), f32(k_pad))
    idx_col = jnp.min(cand_c, axis=-1, keepdims=True).astype(jnp.int32)   # [1, N, 1]
    for c in range(cluster_num):                           # centers keep their own label
        idx_col = jnp.where(sub_iota_f == firsts[c], jnp.int32(c), idx_col)

    # ---------------- merge tokens per cluster (index_add_ as one-hot math) -----
    onehot = (kpad_iota == idx_col).astype(f32)                               # [1, N, Kpad]
    all_w_row = jnp.sum(onehot * tw_col, axis=-2, keepdims=True) + f32(1e-6)  # [1, 1, Kpad]
    gathered = jnp.sum(onehot * all_w_row, axis=-1, keepdims=True)            # [1, N, 1]
    norm_w_col = tw_col / gathered                                            # [1, N, 1]
    xw = x * norm_w_col                                                       # [1, N, C]
    xm_ref[...] = jnp.einsum('bnk,bnc->bkc', onehot, xw,
                             preferred_element_type=f32)    # one MXU issue + one store

    # -------- gathers by idx_token (one-hot over token index, lane-dense out) ---
    it_row = it_ref[...]                                            # [1, 1, N] int32
    oh_t = row_iota == it_row                                       # (t, s): idx_token[s] == t
    idx_f = idx_col.astype(f32)
    itn_row = jnp.sum(jnp.where(oh_t, idx_f, 0.0), axis=-2, keepdims=True)       # [1, 1, N]
    wt_row = jnp.sum(jnp.where(oh_t, norm_w_col, 0.0), axis=-2, keepdims=True)   # [1, 1, N]
    itn_ref[...] = itn_row.astype(jnp.int32)          # exact small ints -> exact cast
    agg_out_ref[...] = agg_ref[...] * wt_row


def ctm_forward(x, idx_token, agg_weight, w, b, noise, cluster_num,
                k_neighbors=K_NEIGHBORS):
    Bb, Nn, Cc = x.shape
    k_pad = max(8, ((cluster_num + 7) // 8) * 8)     # pad cluster dim to full sublane tile

    # lane-friendly re-layouts (all trailing-1 reshapes: no data movement cost)
    x_f = x.astype(jnp.float32)
    w3 = w.reshape(1, 1, Cc).astype(jnp.float32)
    b1 = b.reshape(1).astype(jnp.float32)
    noise3 = noise.reshape(Bb, Nn, 1).astype(jnp.float32)
    it_row = idx_token.reshape(Bb, 1, Nn).astype(jnp.int32)
    agg_row = agg_weight.reshape(Bb, 1, Nn).astype(jnp.float32)

    kernel = functools.partial(_ctm_fused_kernel, cluster_num=cluster_num,
                               k_neighbors=k_neighbors, k_pad=k_pad)

    out_shape = (
        jax.ShapeDtypeStruct((Bb, k_pad, Cc), jnp.float32),   # x_merged (padded clusters)
        jax.ShapeDtypeStruct((Bb, 1, Nn), jnp.int32),         # idx_token_new (lane dense)
        jax.ShapeDtypeStruct((Bb, 1, Nn), jnp.float32),       # agg_weight_new (lane dense)
    )

    xm_pad, itn_row, agg_new_row = pl.pallas_call(
        kernel,
        out_shape=out_shape,
        grid=(Bb,),                                           # batch over the grid -> both
        in_specs=[                                            # TCs on v7x, tiny DMAs pipelined
            pl.BlockSpec((1, Nn, Cc), lambda bi: (bi, 0, 0)),   # x
            pl.BlockSpec((1, 1, Cc), lambda bi: (0, 0, 0)),     # score weight (row form)
            pl.BlockSpec((1, Nn, 1), lambda bi: (bi, 0, 0)),    # density tie-break noise
            pl.BlockSpec((1, 1, Nn), lambda bi: (bi, 0, 0)),    # idx_token (lane dense)
            pl.BlockSpec((1, 1, Nn), lambda bi: (bi, 0, 0)),    # agg_weight (lane dense)
            pl.BlockSpec(memory_space=pltpu.MemorySpace.SMEM),  # scalar bias
        ],
        out_specs=(
            pl.BlockSpec((1, k_pad, Cc), lambda bi: (bi, 0, 0)),
            pl.BlockSpec((1, 1, Nn), lambda bi: (bi, 0, 0)),
            pl.BlockSpec((1, 1, Nn), lambda bi: (bi, 0, 0)),
        ),
        compiler_params=pltpu.CompilerParams(dimension_semantics=("parallel",)),
    )(x_f, w3, noise3, it_row, agg_row, b1)

    x_merged = xm_pad[:, :cluster_num, :]
    idx_token_new = itn_row.reshape(Bb, Nn)
    agg_weight_new = agg_new_row.reshape(Bb, Nn, 1)
    return x_merged, idx_token_new, agg_weight_new


if __name__ == "__main__":
    key = jax.random.PRNGKey(0)
    kx, kw, kn = jax.random.split(key, 3)

    x = jax.random.normal(kx, (B, N, C), dtype=jnp.float32)
    idx_token = jnp.broadcast_to(jnp.arange(N, dtype=jnp.int32)[None, :], (B, N))
    agg_weight = jnp.ones((B, N, 1), jnp.float32)

    # deterministic params for nn.Linear(embed_dim, 1)
    w = jax.random.normal(kw, (C, 1), dtype=jnp.float32) * (1.0 / (C ** 0.5))
    b = jnp.zeros((1,), jnp.float32)
    # deterministic stand-in for torch.rand tie-breaking noise on density
    noise = jax.random.uniform(kn, (B, N, 1), dtype=jnp.float32)

    x_merged, idx_token_new, agg_weight_new = ctm_forward(
        x, idx_token, agg_weight, w, b, noise, CLUSTER_NUM)
    jax.block_until_ready((x_merged, idx_token_new, agg_weight_new))

    assert x_merged.shape == (B, CLUSTER_NUM, C)
    assert idx_token_new.shape == (B, N)
    assert agg_weight_new.shape == (B, N, 1)
    print("KERNEL_OK")
</pallas_src>

<mosaic_0001>
module attributes {stable_mosaic.version = 11 : i64} {
  func.func @_ctm_fused_kernel(%arg0: i32, %arg1: memref<1x16x32xf32, #tpu.memory_space<vmem>>, %arg2: memref<1x1x32xf32, #tpu.memory_space<vmem>>, %arg3: memref<1x16x1xf32, #tpu.memory_space<vmem>>, %arg4: memref<1x1x16xi32, #tpu.memory_space<vmem>>, %arg5: memref<1x1x16xf32, #tpu.memory_space<vmem>>, %arg6: memref<1xf32, #tpu.memory_space<smem>>, %arg7: memref<1x8x32xf32, #tpu.memory_space<vmem>>, %arg8: memref<1x1x16xi32, #tpu.memory_space<vmem>>, %arg9: memref<1x1x16xf32, #tpu.memory_space<vmem>>) attributes {dimension_semantics = [#tpu.dimension_semantics<parallel>], iteration_bounds = array<i64: 2>, scalar_prefetch = 0 : i64, scratch_operands = 0 : i64, tpu.core_type = #tpu.core_type<tc>, window_params = [{transform_indices = @transform_0, window_bounds = array<i64: 1, 16, 32>}, {pipeline_mode = #tpu.pipeline_mode<synchronous>, transform_indices = @transform_1, window_bounds = array<i64: 1, 1, 32>}, {transform_indices = @transform_2, window_bounds = array<i64: 1, 16, 1>}, {transform_indices = @transform_3, window_bounds = array<i64: 1, 1, 16>}, {transform_indices = @transform_4, window_bounds = array<i64: 1, 1, 16>}, {transform_indices = @transform_5, window_bounds = array<i64: 1>}, {transform_indices = @transform_6, window_bounds = array<i64: 1, 8, 32>}, {transform_indices = @transform_7, window_bounds = array<i64: 1, 1, 16>}, {transform_indices = @transform_8, window_bounds = array<i64: 1, 1, 16>}]} {
    %c0 = arith.constant 0 : index
    %c0_0 = arith.constant 0 : index
    %c0_1 = arith.constant 0 : index
    %0 = vector.load %arg1[%c0, %c0_0, %c0_1] : memref<1x16x32xf32, #tpu.memory_space<vmem>>, vector<1x16x32xf32>
    %1 = tpu.iota {dimensions = array<i32: 1>} : vector<1x16x16xi32>
    %2 = tpu.iota {dimensions = array<i32: 2>} : vector<1x16x16xi32>
    %3 = arith.cmpi eq, %1, %2 : vector<1x16x16xi32>
    %4 = tpu.iota {dimensions = array<i32: 1>} : vector<1x16x1xi32>
    %5 = arith.sitofp %4 : vector<1x16x1xi32> to vector<1x16x1xf32>
    %6 = tpu.iota {dimensions = array<i32: 2>} : vector<1x1x16xi32>
    %7 = arith.sitofp %6 : vector<1x1x16xi32> to vector<1x1x16xf32>
    %8 = tpu.iota {dimensions = array<i32: 2>} : vector<1x16x8xi32>
    "tpu.trace_start"() <{level = 10 : i32, message = "bnc,bmc->bnm"}> : () -> ()
    %cst = arith.constant dense<0.000000e+00> : vector<1x16x16xf32>
    %9 = tpu.matmul %0, %0, %cst {dimension_numbers = #tpu.dot_dimension_numbers<[2], [2], [1], [1], [0, 0, 0, 1, 1, 1], [0], [0]>} : vector<1x16x32xf32>, vector<1x16x32xf32>, vector<1x16x16xf32> -> vector<1x16x16xf32>
    "tpu.trace_stop"() : () -> ()
    %10 = arith.mulf %0, %0 : vector<1x16x32xf32>
    %cst_2 = arith.constant dense<0.000000e+00> : vector<1x16xf32>
    %11 = vector.multi_reduction <add>, %10, %cst_2 [2] : vector<1x16x32xf32> to vector<1x16xf32>
    %12 = vector.shape_cast %11 : vector<1x16xf32> to vector<1x16x1xf32>
    %cst_3 = arith.constant 0.000000e+00 : f32
    %13 = vector.shape_cast %12 : vector<1x16x1xf32> to vector<1x16x1xf32>
    %14 = vector.broadcast %13 : vector<1x16x1xf32> to vector<1x16x16xf32>
    %15 = vector.broadcast %cst_3 : f32 to vector<1x16x16xf32>
    %16 = arith.select %3, %14, %15 : vector<1x16x16xi1>, vector<1x16x16xf32>
    %cst_4 = arith.constant dense<0.000000e+00> : vector<1x16xf32>
    %17 = vector.multi_reduction <add>, %16, %cst_4 [1] : vector<1x16x16xf32> to vector<1x16xf32>
    %18 = vector.shape_cast %17 : vector<1x16xf32> to vector<1x1x16xf32>
    %19 = vector.broadcast %12 : vector<1x16x1xf32> to vector<1x16x16xf32>
    %20 = vector.broadcast %18 : vector<1x1x16xf32> to vector<1x16x16xf32>
    %21 = arith.addf %19, %20 : vector<1x16x16xf32>
    %cst_5 = arith.constant 2.000000e+00 : f32
    %22 = vector.broadcast %cst_5 : f32 to vector<1x16x16xf32>
    %23 = arith.mulf %22, %9 : vector<1x16x16xf32>
    %24 = arith.subf %21, %23 : vector<1x16x16xf32>
    %cst_6 = arith.constant 0.000000e+00 : f32
    %25 = vector.broadcast %cst_6 : f32 to vector<1x16x16xf32>
    %26 = arith.maximumf %24, %25 : vector<1x16x16xf32>
    %cst_7 = arith.constant 0.000000e+00 : f32
    %27 = vector.broadcast %cst_7 : f32 to vector<1x16x16xf32>
    %28 = arith.select %3, %27, %26 : vector<1x16x16xi1>, vector<1x16x16xf32>
    %cst_8 = arith.constant dense<0xFF800000> : vector<1x16xf32>
    %29 = vector.multi_reduction <maximumf>, %28, %cst_8 [1] : vector<1x16x16xf32> to vector<1x16xf32>
    %30 = vector.shape_cast %29 : vector<1x16xf32> to vector<1x1x16xf32>
    %cst_9 = arith.constant dense<0xFF800000> : vector<1x1xf32>
    %31 = vector.multi_reduction <maximumf>, %30, %cst_9 [2] : vector<1x1x16xf32> to vector<1x1xf32>
    %32 = vector.shape_cast %31 : vector<1x1xf32> to vector<1x1x1xf32>
    %cst_10 = arith.constant 0.000000e+00 : f32
    %33 = vector.broadcast %cst_10 : f32 to vector<1x16x1xf32>
    %cst_11 = arith.constant dense<0x7F800000> : vector<1x16xf32>
    %34 = vector.multi_reduction <minimumf>, %28, %cst_11 [2] : vector<1x16x16xf32> to vector<1x16xf32>
    %35 = vector.shape_cast %34 : vector<1x16xf32> to vector<1x16x1xf32>
    %36 = arith.addf %33, %35 : vector<1x16x1xf32>
    %37 = vector.broadcast %35 : vector<1x16x1xf32> to vector<1x16x16xf32>
    %38 = arith.cmpf oeq, %28, %37 : vector<1x16x16xf32>
    %cst_12 = arith.constant 1.000000e+30 : f32
    %39 = vector.broadcast %cst_12 : f32 to vector<1x16x16xf32>
    %40 = arith.select %38, %39, %28 : vector<1x16x16xi1>, vector<1x16x16xf32>
    %cst_13 = arith.constant dense<0x7F800000> : vector<1x16xf32>
    %41 = vector.multi_reduction <minimumf>, %40, %cst_13 [2] : vector<1x16x16xf32> to vector<1x16xf32>
    %42 = vector.shape_cast %41 : vector<1x16xf32> to vector<1x16x1xf32>
    %43 = arith.addf %36, %42 : vector<1x16x1xf32>
    %44 = vector.broadcast %42 : vector<1x16x1xf32> to vector<1x16x16xf32>
    %45 = arith.cmpf oeq, %40, %44 : vector<1x16x16xf32>
    %cst_14 = arith.constant 1.000000e+30 : f32
    %46 = vector.broadcast %cst_14 : f32 to vector<1x16x16xf32>
    %47 = arith.select %45, %46, %40 : vector<1x16x16xi1>, vector<1x16x16xf32>
    %cst_15 = arith.constant dense<0x7F800000> : vector<1x16xf32>
    %48 = vector.multi_reduction <minimumf>, %47, %cst_15 [2] : vector<1x16x16xf32> to vector<1x16xf32>
    %49 = vector.shape_cast %48 : vector<1x16xf32> to vector<1x16x1xf32>
    %50 = arith.addf %43, %49 : vector<1x16x1xf32>
    %51 = vector.broadcast %49 : vector<1x16x1xf32> to vector<1x16x16xf32>
    %52 = arith.cmpf oeq, %47, %51 : vector<1x16x16xf32>
    %cst_16 = arith.constant 1.000000e+30 : f32
    %53 = vector.broadcast %cst_16 : f32 to vector<1x16x16xf32>
    %54 = arith.select %52, %53, %47 : vector<1x16x16xi1>, vector<1x16x16xf32>
    %cst_17 = arith.constant dense<0x7F800000> : vector<1x16xf32>
    %55 = vector.multi_reduction <minimumf>, %54, %cst_17 [2] : vector<1x16x16xf32> to vector<1x16xf32>
    %56 = vector.shape_cast %55 : vector<1x16xf32> to vector<1x16x1xf32>
    %57 = arith.addf %50, %56 : vector<1x16x1xf32>
    %58 = vector.broadcast %56 : vector<1x16x1xf32> to vector<1x16x16xf32>
    %59 = arith.cmpf oeq, %54, %58 : vector<1x16x16xf32>
    %cst_18 = arith.constant 1.000000e+30 : f32
    %60 = vector.broadcast %cst_18 : f32 to vector<1x16x16xf32>
    %61 = arith.select %59, %60, %54 : vector<1x16x16xi1>, vector<1x16x16xf32>
    %cst_19 = arith.constant dense<0x7F800000> : vector<1x16xf32>
    %62 = vector.multi_reduction <minimumf>, %61, %cst_19 [2] : vector<1x16x16xf32> to vector<1x16xf32>
    %63 = vector.shape_cast %62 : vector<1x16xf32> to vector<1x16x1xf32>
    %64 = arith.addf %57, %63 : vector<1x16x1xf32>
    %cst_20 = arith.constant 6.250000e-03 : f32
    %65 = vector.broadcast %cst_20 : f32 to vector<1x16x1xf32>
    %66 = arith.mulf %64, %65 : vector<1x16x1xf32>
    %cst_21 = arith.constant 0.000000e+00 : f32
    %67 = vector.broadcast %cst_21 : f32 to vector<1x16x1xf32>
    %68 = arith.subf %67, %66 : vector<1x16x1xf32>
    %69 = math.exp %68 : vector<1x16x1xf32>
    %c0_22 = arith.constant 0 : index
    %c0_23 = arith.constant 0 : index
    %c0_24 = arith.constant 0 : index
    %70 = vector.load %arg3[%c0_22, %c0_23, %c0_24] : memref<1x16x1xf32, #tpu.memory_space<vmem>>, vector<1x16x1xf32>
    %cst_25 = arith.constant 9.99999997E-7 : f32
    %71 = vector.broadcast %cst_25 : f32 to vector<1x16x1xf32>
    %72 = arith.mulf %70, %71 : vector<1x16x1xf32>
    %73 = arith.addf %69, %72 : vector<1x16x1xf32>
    %cst_26 = arith.constant 0.000000e+00 : f32
    %74 = vector.shape_cast %73 : vector<1x16x1xf32> to vector<1x16x1xf32>
    %75 = vector.broadcast %74 : vector<1x16x1xf32> to vector<1x16x16xf32>
    %76 = vector.broadcast %cst_26 : f32 to vector<1x16x16xf32>
    %77 = arith.select %3, %75, %76 : vector<1x16x16xi1>, vector<1x16x16xf32>
    %cst_27 = arith.constant dense<0.000000e+00> : vector<1x16xf32>
    %78 = vector.multi_reduction <add>, %77, %cst_27 [1] : vector<1x16x16xf32> to vector<1x16xf32>
    %79 = vector.shape_cast %78 : vector<1x16xf32> to vector<1x1x16xf32>
    %80 = vector.broadcast %73 : vector<1x16x1xf32> to vector<1x16x16xf32>
    %81 = vector.broadcast %79 : vector<1x1x16xf32> to vector<1x16x16xf32>
    %82 = arith.cmpf ogt, %80, %81 : vector<1x16x16xf32>
    %83 = vector.shape_cast %32 : vector<1x1x1xf32> to vector<1x1x1xf32>
    %84 = vector.broadcast %83 : vector<1x1x1xf32> to vector<1x16x16xf32>
    %85 = arith.select %82, %28, %84 : vector<1x16x16xi1>, vector<1x16x16xf32>
    %cst_28 = arith.constant dense<0x7F800000> : vector<1x16xf32>
    %86 = vector.multi_reduction <minimumf>, %85, %cst_28 [1] : vector<1x16x16xf32> to vector<1x16xf32>
    %87 = vector.shape_cast %86 : vector<1x16xf32> to vector<1x1x16xf32>
    %88 = math.sqrt %87 : vector<1x1x16xf32>
    %cst_29 = arith.constant 0.176776692 : f32
    %89 = vector.broadcast %cst_29 : f32 to vector<1x1x16xf32>
    %90 = arith.mulf %88, %89 : vector<1x1x16xf32>
    %91 = arith.mulf %90, %79 : vector<1x1x16xf32>
    %c0_30 = arith.constant 0 : index
    %c0_31 = arith.constant 0 : index
    %c0_32 = arith.constant 0 : index
    %92 = vector.load %arg2[%c0_30, %c0_31, %c0_32] : memref<1x1x32xf32, #tpu.memory_space<vmem>>, vector<1x1x32xf32>
    %93 = vector.broadcast %92 : vector<1x1x32xf32> to vector<1x16x32xf32>
    %94 = arith.mulf %0, %93 : vector<1x16x32xf32>
    %cst_33 = arith.constant dense<0.000000e+00> : vector<1x16xf32>
    %95 = vector.multi_reduction <add>, %94, %cst_33 [2] : vector<1x16x32xf32> to vector<1x16xf32>
    %96 = vector.shape_cast %95 : vector<1x16xf32> to vector<1x16x1xf32>
    %c0_34 = arith.constant 0 : index
    %97 = memref.load %arg6[%c0_34] : memref<1xf32, #tpu.memory_space<smem>>
    %98 = vector.broadcast %97 : f32 to vector<1x16x1xf32>
    %99 = arith.addf %96, %98 : vector<1x16x1xf32>
    %100 = math.exp %99 : vector<1x16x1xf32>
    %cst_35 = arith.constant 0.000000e+00 : f32
    %101 = vector.broadcast %cst_35 : f32 to vector<1x16x8xf32>
    %cst_36 = arith.constant dense<0xFF800000> : vector<1x1xf32>
    %102 = vector.multi_reduction <maximumf>, %91, %cst_36 [2] : vector<1x1x16xf32> to vector<1x1xf32>
    %103 = vector.shape_cast %102 : vector<1x1xf32> to vector<1x1x1xf32>
    %104 = vector.broadcast %103 : vector<1x1x1xf32> to vector<1x1x16xf32>
    %105 = arith.cmpf oeq, %91, %104 : vector<1x1x16xf32>
    %cst_37 = arith.constant 1.600000e+01 : f32
    %106 = vector.broadcast %cst_37 : f32 to vector<1x1x16xf32>
    %107 = arith.select %105, %7, %106 : vector<1x1x16xi1>, vector<1x1x16xf32>
    %cst_38 = arith.constant dense<0x7F800000> : vector<1x1xf32>
    %108 = vector.multi_reduction <minimumf>, %107, %cst_38 [2] : vector<1x1x16xf32> to vector<1x1xf32>
    %109 = vector.shape_cast %108 : vector<1x1xf32> to vector<1x1x1xf32>
    %110 = vector.broadcast %109 : vector<1x1x1xf32> to vector<1x1x16xf32>
    %111 = arith.cmpf oeq, %7, %110 : vector<1x1x16xf32>
    %cst_39 = arith.constant 0.000000e+00 : f32
    %cst_40 = arith.constant 1.000000e+30 : f32
    %112 = arith.subf %cst_39, %cst_40 : f32
    %113 = vector.broadcast %112 : f32 to vector<1x1x16xf32>
    %114 = arith.select %111, %113, %91 : vector<1x1x16xi1>, vector<1x1x16xf32>
    %115 = vector.broadcast %109 : vector<1x1x1xf32> to vector<1x16x1xf32>
    %116 = arith.cmpf oeq, %5, %115 : vector<1x16x1xf32>
    %c0_i32 = arith.constant 0 : i32
    %117 = vector.broadcast %c0_i32 : i32 to vector<1x16x8xi32>
    %118 = arith.cmpi eq, %8, %117 : vector<1x16x8xi32>
    %119 = vector.broadcast %116 : vector<1x16x1xi1> to vector<1x16x8xi1>
    %120 = arith.andi %119, %118 : vector<1x16x8xi1>
    %cst_41 = arith.constant 1.000000e+00 : f32
    %cst_42 = arith.constant 0.000000e+00 : f32
    %121 = vector.broadcast %cst_41 : f32 to vector<1x16x8xf32>
    %122 = vector.broadcast %cst_42 : f32 to vector<1x16x8xf32>
    %123 = arith.select %120, %121, %122 : vector<1x16x8xi1>, vector<1x16x8xf32>
    %124 = arith.addf %101, %123 : vector<1x16x8xf32>
    %cst_43 = arith.constant dense<0xFF800000> : vector<1x1xf32>
    %125 = vector.multi_reduction <maximumf>, %114, %cst_43 [2] : vector<1x1x16xf32> to vector<1x1xf32>
    %126 = vector.shape_cast %125 : vector<1x1xf32> to vector<1x1x1xf32>
    %127 = vector.broadcast %126 : vector<1x1x1xf32> to vector<1x1x16xf32>
    %128 = arith.cmpf oeq, %114, %127 : vector<1x1x16xf32>
    %cst_44 = arith.constant 1.600000e+01 : f32
    %129 = vector.broadcast %cst_44 : f32 to vector<1x1x16xf32>
    %130 = arith.select %128, %7, %129 : vector<1x1x16xi1>, vector<1x1x16xf32>
    %cst_45 = arith.constant dense<0x7F800000> : vector<1x1xf32>
    %131 = vector.multi_reduction <minimumf>, %130, %cst_45 [2] : vector<1x1x16xf32> to vector<1x1xf32>
    %132 = vector.shape_cast %131 : vector<1x1xf32> to vector<1x1x1xf32>
    %133 = vector.broadcast %132 : vector<1x1x1xf32> to vector<1x1x16xf32>
    %134 = arith.cmpf oeq, %7, %133 : vector<1x1x16xf32>
    %cst_46 = arith.constant 0.000000e+00 : f32
    %cst_47 = arith.constant 1.000000e+30 : f32
    %135 = arith.subf %cst_46, %cst_47 : f32
    %136 = vector.broadcast %135 : f32 to vector<1x1x16xf32>
    %137 = arith.select %134, %136, %114 : vector<1x1x16xi1>, vector<1x1x16xf32>
    %138 = vector.broadcast %132 : vector<1x1x1xf32> to vector<1x16x1xf32>
    %139 = arith.cmpf oeq, %5, %138 : vector<1x16x1xf32>
    %c1_i32 = arith.constant 1 : i32
    %140 = vector.broadcast %c1_i32 : i32 to vector<1x16x8xi32>
    %141 = arith.cmpi eq, %8, %140 : vector<1x16x8xi32>
    %142 = vector.broadcast %139 : vector<1x16x1xi1> to vector<1x16x8xi1>
    %143 = arith.andi %142, %141 : vector<1x16x8xi1>
    %cst_48 = arith.constant 1.000000e+00 : f32
    %cst_49 = arith.constant 0.000000e+00 : f32
    %144 = vector.broadcast %cst_48 : f32 to vector<1x16x8xf32>
    %145 = vector.broadcast %cst_49 : f32 to vector<1x16x8xf32>
    %146 = arith.select %143, %144, %145 : vector<1x16x8xi1>, vector<1x16x8xf32>
    %147 = arith.addf %124, %146 : vector<1x16x8xf32>
    %cst_50 = arith.constant dense<0xFF800000> : vector<1x1xf32>
    %148 = vector.multi_reduction <maximumf>, %137, %cst_50 [2] : vector<1x1x16xf32> to vector<1x1xf32>
    %149 = vector.shape_cast %148 : vector<1x1xf32> to vector<1x1x1xf32>
    %150 = vector.broadcast %149 : vector<1x1x1xf32> to vector<1x1x16xf32>
    %151 = arith.cmpf oeq, %137, %150 : vector<1x1x16xf32>
    %cst_51 = arith.constant 1.600000e+01 : f32
    %152 = vector.broadcast %cst_51 : f32 to vector<1x1x16xf32>
    %153 = arith.select %151, %7, %152 : vector<1x1x16xi1>, vector<1x1x16xf32>
    %cst_52 = arith.constant dense<0x7F800000> : vector<1x1xf32>
    %154 = vector.multi_reduction <minimumf>, %153, %cst_52 [2] : vector<1x1x16xf32> to vector<1x1xf32>
    %155 = vector.shape_cast %154 : vector<1x1xf32> to vector<1x1x1xf32>
    %156 = vector.broadcast %155 : vector<1x1x1xf32> to vector<1x1x16xf32>
    %157 = arith.cmpf oeq, %7, %156 : vector<1x1x16xf32>
    %cst_53 = arith.constant 0.000000e+00 : f32
    %cst_54 = arith.constant 1.000000e+30 : f32
    %158 = arith.subf %cst_53, %cst_54 : f32
    %159 = vector.broadcast %158 : f32 to vector<1x1x16xf32>
    %160 = arith.select %157, %159, %137 : vector<1x1x16xi1>, vector<1x1x16xf32>
    %161 = vector.broadcast %155 : vector<1x1x1xf32> to vector<1x16x1xf32>
    %162 = arith.cmpf oeq, %5, %161 : vector<1x16x1xf32>
    %c2_i32 = arith.constant 2 : i32
    %163 = vector.broadcast %c2_i32 : i32 to vector<1x16x8xi32>
    %164 = arith.cmpi eq, %8, %163 : vector<1x16x8xi32>
    %165 = vector.broadcast %162 : vector<1x16x1xi1> to vector<1x16x8xi1>
    %166 = arith.andi %165, %164 : vector<1x16x8xi1>
    %cst_55 = arith.constant 1.000000e+00 : f32
    %cst_56 = arith.constant 0.000000e+00 : f32
    %167 = vector.broadcast %cst_55 : f32 to vector<1x16x8xf32>
    %168 = vector.broadcast %cst_56 : f32 to vector<1x16x8xf32>
    %169 = arith.select %166, %167, %168 : vector<1x16x8xi1>, vector<1x16x8xf32>
    %170 = arith.addf %147, %169 : vector<1x16x8xf32>
    %cst_57 = arith.constant dense<0xFF800000> : vector<1x1xf32>
    %171 = vector.multi_reduction <maximumf>, %160, %cst_57 [2] : vector<1x1x16xf32> to vector<1x1xf32>
    %172 = vector.shape_cast %171 : vector<1x1xf32> to vector<1x1x1xf32>
    %173 = vector.broadcast %172 : vector<1x1x1xf32> to vector<1x1x16xf32>
    %174 = arith.cmpf oeq, %160, %173 : vector<1x1x16xf32>
    %cst_58 = arith.constant 1.600000e+01 : f32
    %175 = vector.broadcast %cst_58 : f32 to vector<1x1x16xf32>
    %176 = arith.select %174, %7, %175 : vector<1x1x16xi1>, vector<1x1x16xf32>
    %cst_59 = arith.constant dense<0x7F800000> : vector<1x1xf32>
    %177 = vector.multi_reduction <minimumf>, %176, %cst_59 [2] : vector<1x1x16xf32> to vector<1x1xf32>
    %178 = vector.shape_cast %177 : vector<1x1xf32> to vector<1x1x1xf32>
    %179 = vector.broadcast %178 : vector<1x1x1xf32> to vector<1x16x1xf32>
    %180 = arith.cmpf oeq, %5, %179 : vector<1x16x1xf32>
    %c3_i32 = arith.constant 3 : i32
    %181 = vector.broadcast %c3_i32 : i32 to vector<1x16x8xi32>
    %182 = arith.cmpi eq, %8, %181 : vector<1x16x8xi32>
    %183 = vector.broadcast %180 : vector<1x16x1xi1> to vector<1x16x8xi1>
    %184 = arith.andi %183, %182 : vector<1x16x8xi1>
    %cst_60 = arith.constant 1.000000e+00 : f32
    %cst_61 = arith.constant 0.000000e+00 : f32
    %185 = vector.broadcast %cst_60 : f32 to vector<1x16x8xf32>
    %186 = vector.broadcast %cst_61 : f32 to vector<1x16x8xf32>
    %187 = arith.select %184, %185, %186 : vector<1x16x8xi1>, vector<1x16x8xf32>
    %188 = arith.addf %170, %187 : vector<1x16x8xf32>
    "tpu.trace_start"() <{level = 10 : i32, message = "bnm,bmk->bnk"}> : () -> ()
    %cst_62 = arith.constant dense<0.000000e+00> : vector<1x16x8xf32>
    %189 = tpu.matmul %28, %188, %cst_62 {dimension_numbers = #tpu.dot_dimension_numbers<[2], [1], [1], [2], [0, 0, 0, 1, 1, 2], [0], [0]>} : vector<1x16x16xf32>, vector<1x16x8xf32>, vector<1x16x8xf32> -> vector<1x16x8xf32>
    %c4_i32 = arith.constant 4 : i32
    "tpu.trace_stop"() : () -> ()
    %190 = vector.broadcast %c4_i32 : i32 to vector<1x16x8xi32>
    %191 = arith.cmpi slt, %8, %190 : vector<1x16x8xi32>
    %cst_63 = arith.constant 1.000000e+30 : f32
    %192 = vector.broadcast %cst_63 : f32 to vector<1x16x8xf32>
    %193 = arith.select %191, %189, %192 : vector<1x16x8xi1>, vector<1x16x8xf32>
    %cst_64 = arith.constant dense<0x7F800000> : vector<1x16xf32>
    %194 = vector.multi_reduction <minimumf>, %193, %cst_64 [2] : vector<1x16x8xf32> to vector<1x16xf32>
    %195 = vector.shape_cast %194 : vector<1x16xf32> to vector<1x16x1xf32>
    %196 = vector.broadcast %195 : vector<1x16x1xf32> to vector<1x16x8xf32>
    %197 = arith.cmpf oeq, %193, %196 : vector<1x16x8xf32>
    %198 = arith.sitofp %8 : vector<1x16x8xi32> to vector<1x16x8xf32>
    %cst_65 = arith.constant 8.000000e+00 : f32
    %199 = vector.broadcast %cst_65 : f32 to vector<1x16x8xf32>
    %200 = arith.select %197, %198, %199 : vector<1x16x8xi1>, vector<1x16x8xf32>
    %cst_66 = arith.constant dense<0x7F800000> : vector<1x16xf32>
    %201 = vector.multi_reduction <minimumf>, %200, %cst_66 [2] : vector<1x16x8xf32> to vector<1x16xf32>
    %202 = vector.shape_cast %201 : vector<1x16xf32> to vector<1x16x1xf32>
    %203 = arith.fptosi %202 : vector<1x16x1xf32> to vector<1x16x1xi32>
    %204 = vector.broadcast %109 : vector<1x1x1xf32> to vector<1x16x1xf32>
    %205 = arith.cmpf oeq, %5, %204 : vector<1x16x1xf32>
    %c0_i32_67 = arith.constant 0 : i32
    %206 = vector.broadcast %c0_i32_67 : i32 to vector<1x16x1xi32>
    %207 = arith.select %205, %206, %203 : vector<1x16x1xi1>, vector<1x16x1xi32>
    %208 = vector.broadcast %132 : vector<1x1x1xf32> to vector<1x16x1xf32>
    %209 = arith.cmpf oeq, %5, %208 : vector<1x16x1xf32>
    %c1_i32_68 = arith.constant 1 : i32
    %210 = vector.broadcast %c1_i32_68 : i32 to vector<1x16x1xi32>
    %211 = arith.select %209, %210, %207 : vector<1x16x1xi1>, vector<1x16x1xi32>
    %212 = vector.broadcast %155 : vector<1x1x1xf32> to vector<1x16x1xf32>
    %213 = arith.cmpf oeq, %5, %212 : vector<1x16x1xf32>
    %c2_i32_69 = arith.constant 2 : i32
    %214 = vector.broadcast %c2_i32_69 : i32 to vector<1x16x1xi32>
    %215 = arith.select %213, %214, %211 : vector<1x16x1xi1>, vector<1x16x1xi32>
    %216 = vector.broadcast %178 : vector<1x1x1xf32> to vector<1x16x1xf32>
    %217 = arith.cmpf oeq, %5, %216 : vector<1x16x1xf32>
    %c3_i32_70 = arith.constant 3 : i32
    %218 = vector.broadcast %c3_i32_70 : i32 to vector<1x16x1xi32>
    %219 = arith.select %217, %218, %215 : vector<1x16x1xi1>, vector<1x16x1xi32>
    %220 = vector.broadcast %219 : vector<1x16x1xi32> to vector<1x16x8xi32>
    %221 = arith.cmpi eq, %8, %220 : vector<1x16x8xi32>
    %222 = arith.extui %221 : vector<1x16x8xi1> to vector<1x16x8xi32>
    %223 = arith.sitofp %222 : vector<1x16x8xi32> to vector<1x16x8xf32>
    %224 = vector.broadcast %100 : vector<1x16x1xf32> to vector<1x16x8xf32>
    %225 = arith.mulf %223, %224 : vector<1x16x8xf32>
    %cst_71 = arith.constant dense<0.000000e+00> : vector<1x8xf32>
    %226 = vector.multi_reduction <add>, %225, %cst_71 [1] : vector<1x16x8xf32> to vector<1x8xf32>
    %227 = vector.shape_cast %226 : vector<1x8xf32> to vector<1x1x8xf32>
    %cst_72 = arith.constant 9.99999997E-7 : f32
    %228 = vector.broadcast %cst_72 : f32 to vector<1x1x8xf32>
    %229 = arith.addf %227, %228 : vector<1x1x8xf32>
    %230 = vector.broadcast %229 : vector<1x1x8xf32> to vector<1x16x8xf32>
    %231 = arith.mulf %223, %230 : vector<1x16x8xf32>
    %cst_73 = arith.constant dense<0.000000e+00> : vector<1x16xf32>
    %232 = vector.multi_reduction <add>, %231, %cst_73 [2] : vector<1x16x8xf32> to vector<1x16xf32>
    %233 = vector.shape_cast %232 : vector<1x16xf32> to vector<1x16x1xf32>
    %234 = arith.divf %100, %233 : vector<1x16x1xf32>
    %235 = vector.broadcast %234 : vector<1x16x1xf32> to vector<1x16x32xf32>
    %236 = arith.mulf %0, %235 : vector<1x16x32xf32>
    "tpu.trace_start"() <{level = 10 : i32, message = "bnk,bnc->bkc"}> : () -> ()
    %cst_74 = arith.constant dense<0.000000e+00> : vector<1x8x32xf32>
    %237 = tpu.matmul %223, %236, %cst_74 {dimension_numbers = #tpu.dot_dimension_numbers<[1], [1], [2], [2], [0, 0, 0, 2, 1, 2], [0], [0]>} : vector<1x16x8xf32>, vector<1x16x32xf32>, vector<1x8x32xf32> -> vector<1x8x32xf32>
    "tpu.trace_stop"() : () -> ()
    %c0_75 = arith.constant 0 : index
    %c0_76 = arith.constant 0 : index
    %c0_77 = arith.constant 0 : index
    %238 = vector.load %arg7[%c0_75, %c0_76, %c0_77] : memref<1x8x32xf32, #tpu.memory_space<vmem>>, vector<1x8x32xf32>
    tpu.vector_store %arg7[%c0_75, %c0_76, %c0_77], %237 {strides = array<i32>} : memref<1x8x32xf32, #tpu.memory_space<vmem>>, vector<1x8x32xf32>,
    %c0_78 = arith.constant 0 : index
    %c0_79 = arith.constant 0 : index
    %c0_80 = arith.constant 0 : index
    %239 = vector.load %arg4[%c0_78, %c0_79, %c0_80] : memref<1x1x16xi32, #tpu.memory_space<vmem>>, vector<1x1x16xi32>
    %240 = vector.broadcast %239 : vector<1x1x16xi32> to vector<1x16x16xi32>
    %241 = arith.cmpi eq, %1, %240 : vector<1x16x16xi32>
    %242 = arith.sitofp %219 : vector<1x16x1xi32> to vector<1x16x1xf32>
    %cst_81 = arith.constant 0.000000e+00 : f32
    %243 = vector.shape_cast %242 : vector<1x16x1xf32> to vector<1x16x1xf32>
    %244 = vector.broadcast %243 : vector<1x16x1xf32> to vector<1x16x16xf32>
    %245 = vector.broadcast %cst_81 : f32 to vector<1x16x16xf32>
    %246 = arith.select %241, %244, %245 : vector<1x16x16xi1>, vector<1x16x16xf32>
    %cst_82 = arith.constant dense<0.000000e+00> : vector<1x16xf32>
    %247 = vector.multi_reduction <add>, %246, %cst_82 [1] : vector<1x16x16xf32> to vector<1x16xf32>
    %248 = vector.shape_cast %247 : vector<1x16xf32> to vector<1x1x16xf32>
    %cst_83 = arith.constant 0.000000e+00 : f32
    %249 = vector.shape_cast %234 : vector<1x16x1xf32> to vector<1x16x1xf32>
    %250 = vector.broadcast %249 : vector<1x16x1xf32> to vector<1x16x16xf32>
    %251 = vector.broadcast %cst_83 : f32 to vector<1x16x16xf32>
    %252 = arith.select %241, %250, %251 : vector<1x16x16xi1>, vector<1x16x16xf32>
    %cst_84 = arith.constant dense<0.000000e+00> : vector<1x16xf32>
    %253 = vector.multi_reduction <add>, %252, %cst_84 [1] : vector<1x16x16xf32> to vector<1x16xf32>
    %254 = vector.shape_cast %253 : vector<1x16xf32> to vector<1x1x16xf32>
    %255 = arith.fptosi %248 : vector<1x1x16xf32> to vector<1x1x16xi32>
    %c0_85 = arith.constant 0 : index
    %c0_86 = arith.constant 0 : index
    %c0_87 = arith.constant 0 : index
    %256 = vector.load %arg8[%c0_85, %c0_86, %c0_87] : memref<1x1x16xi32, #tpu.memory_space<vmem>>, vector<1x1x16xi32>
    tpu.vector_store %arg8[%c0_85, %c0_86, %c0_87], %255 {strides = array<i32>} : memref<1x1x16xi32, #tpu.memory_space<vmem>>, vector<1x1x16xi32>,
    %c0_88 = arith.constant 0 : index
    %c0_89 = arith.constant 0 : index
    %c0_90 = arith.constant 0 : index
    %257 = vector.load %arg5[%c0_88, %c0_89, %c0_90] : memref<1x1x16xf32, #tpu.memory_space<vmem>>, vector<1x1x16xf32>
    %258 = arith.mulf %257, %254 : vector<1x1x16xf32>
    %c0_91 = arith.constant 0 : index
    %c0_92 = arith.constant 0 : index
    %c0_93 = arith.constant 0 : index
    %259 = vector.load %arg9[%c0_91, %c0_92, %c0_93] : memref<1x1x16xf32, #tpu.memory_space<vmem>>, vector<1x1x16xf32>
    tpu.vector_store %arg9[%c0_91, %c0_92, %c0_93], %258 {strides = array<i32>} : memref<1x1x16xf32, #tpu.memory_space<vmem>>, vector<1x1x16xf32>,
    return
  }
  func.func @transform_0(%arg0: i32) -> (i32, i32, i32) {
    %c0_i32 = arith.constant 0 : i32
    %c0_i32_0 = arith.constant 0 : i32
    %c0_i32_1 = arith.constant 0 : i32
    return %arg0, %c0_i32, %c0_i32_0 : i32, i32, i32
  }
  func.func @transform_1(%arg0: i32) -> (i32, i32, i32) {
    %c0_i32 = arith.constant 0 : i32
    %c0_i32_0 = arith.constant 0 : i32
    %c0_i32_1 = arith.constant 0 : i32
    %c0_i32_2 = arith.constant 0 : i32
    return %c0_i32, %c0_i32_0, %c0_i32_1 : i32, i32, i32
  }
  func.func @transform_2(%arg0: i32) -> (i32, i32, i32) {
    %c0_i32 = arith.constant 0 : i32
    %c0_i32_0 = arith.constant 0 : i32
    %c0_i32_1 = arith.constant 0 : i32
    return %arg0, %c0_i32, %c0_i32_0 : i32, i32, i32
  }
  func.func @transform_3(%arg0: i32) -> (i32, i32, i32) {
    %c0_i32 = arith.constant 0 : i32
    %c0_i32_0 = arith.constant 0 : i32
    %c0_i32_1 = arith.constant 0 : i32
    return %arg0, %c0_i32, %c0_i32_0 : i32, i32, i32
  }
  func.func @transform_4(%arg0: i32) -> (i32, i32, i32) {
    %c0_i32 = arith.constant 0 : i32
    %c0_i32_0 = arith.constant 0 : i32
    %c0_i32_1 = arith.constant 0 : i32
    return %arg0, %c0_i32, %c0_i32_0 : i32, i32, i32
  }
  func.func @transform_5(%arg0: i32) -> i32 {
    %c0_i32 = arith.constant 0 : i32
    %c0_i32_0 = arith.constant 0 : i32
    return %c0_i32 : i32
  }
  func.func @transform_6(%arg0: i32) -> (i32, i32, i32) {
    %c0_i32 = arith.constant 0 : i32
    %c0_i32_0 = arith.constant 0 : i32
    %c0_i32_1 = arith.constant 0 : i32
    return %arg0, %c0_i32, %c0_i32_0 : i32, i32, i32
  }
  func.func @transform_7(%arg0: i32) -> (i32, i32, i32) {
    %c0_i32 = arith.constant 0 : i32
    %c0_i32_0 = arith.constant 0 : i32
    %c0_i32_1 = arith.constant 0 : i32
    return %arg0, %c0_i32, %c0_i32_0 : i32, i32, i32
  }
  func.func @transform_8(%arg0: i32) -> (i32, i32, i32) {
    %c0_i32 = arith.constant 0 : i32
    %c0_i32_0 = arith.constant 0 : i32
    %c0_i32_1 = arith.constant 0 : i32
    return %arg0, %c0_i32, %c0_i32_0 : i32, i32, i32
  }
}

</mosaic_0001>

<bundles_post_ra>
// kernel: tpu_custom_call.1
= control target key start
LH: loop header
LB: loop body
LE: loop exit
PB: predicated region body
PF: predicated region fallthrough
CT: control target
= control target key end

     0   :  { %s1852_s0 = inlined_call_operand.vmem [shape: f32[2,16,32], index: 0, kind: input, shape index: {}]   ;;  %s1853_s1 = inlined_call_operand.hbm [shape: f32[1,1,32], index: 1, kind: input, shape index: {}]   ;;  %s1854_s2 = inlined_call_operand.vmem [shape: f32[2,16,1], index: 2, kind: input, shape index: {}]   ;;  %s1855_s3 = inlined_call_operand.vmem [shape: s32[2,1,16], index: 3, kind: input, shape index: {}]   ;;  %s1856_s4 = inlined_call_operand.vmem [shape: f32[2,1,16], index: 4, kind: input, shape index: {}]   ;;  %s1857_s5 = inlined_call_operand.<no memory space> [shape: f32[1], index: 5, kind: input, shape index: {}]   ;;  %s1858_s6 = inlined_call_operand.hbm [shape: f32[2,8,32], index: 6, kind: output, shape index: {0}]   ;;  %s1859_s7 = inlined_call_operand.hbm [shape: s32[2,1,16], index: 7, kind: output, shape index: {1}]   ;;  %s1860_s8 = inlined_call_operand.hbm [shape: f32[2,1,16], index: 8, kind: output, shape index: {2}]  }
   0x1   :  { %1863 = sst [smem:[#allocation13_spill]] %s1852_s0 }
   0x2   :  { %1864 = sst [smem:[#allocation14_spill]] %s1853_s1 }
   0x3   :  { %14 = sst [smem:[#allocation2]] %s1857_s5 }
   0x4   :  { %15 = vsyncpa [#allocation4], 0 }
   0x5   :  { %16 = vsyncpa [#allocation5], 0 }
   0x6   :  { %18 = vsyncpa [#allocation5 + $0x1], 0 }
   0x7   :  { %19 = vsyncpa [#allocation8], 0 }
   0x8   :  { %21 = vsyncpa [#allocation8 + $0x1], 0  ;;  %s1439_s29 = smov 0   ;;  %s1441_s30 = smov 0  }
   0x9   :  { %s1443_s9 = smov 0   ;;  %s1445_s10 = smov 0  }
   0xa LB: > { %s1460_s5 = sadd.s32 4294967295, %s1386_s10   ;;  %s1862_s11 = sadd.s32 4294967294, %s1386_s10   ;;  %s1386_s10 = sphi %s1445_s10, %s1874_s10   ;;  %s1382_s9 = sphi %s1443_s9, %s1873_s9   ;;  %s1378_s30 = sphi %s1441_s30, %s1872_s30   ;;  %s1374_s29 = sphi %s1439_s29, %s1871_s29  }
   0xb   : > { %s1464_s12 = sadd.s32 1, %s1386_s10   ;;  %s180_s13 = sadd.s32 1, %s1382_s9 }
   0xc   : > { %s177_s14 = ssub.s32 %s1386_s10, %s1464_s12  ;;  %p190_p0 = scmp.ne.s32.totalorder %s1382_s9, %s1378_s30 }
   0xd   : > { %p178_p1 = scmp.eq.s32.totalorder %s177_s14, 0  ;;  %p191_p2 = scmp.eq.s32.totalorder %s1460_s5, 1 }
   0xe   : > { %p196_p3 = scmp.ne.s32.totalorder %s1378_s30, %s1374_s29  ;;  %p197_p4 = scmp.eq.s32.totalorder %s1862_s11, 1 }
   0xf   : > { %s1477_s15 = scalar_select %p178_p1, %s1382_s9, %s180_s13  }
  0x10   : > { %p1479_p5 = por %p191_p2, %p190_p0  ;;  %p1483_p6 = por %p197_p4, %p196_p3 }
  0x11   : > { %p1108_p7 = scmp.ge.s32.totalorder %s1386_s10, 1  ;;  %p256_p8 = scmp.lt.s32.totalorder %s1386_s10, 3 }
  0x12   : > { %p1174_p9 = scmp.eq.s32.totalorder %s1460_s5, 0  ;;  %s1867_s1 = sld [smem:[#allocation14_spill]] }
  0x13   : > { %p257_p10 = pnand %p1108_p7, %p256_p8  ;;  %s1388_s21 = smov [#allocation3]  }
  0x14   : > { %s270_s22 = sshll.u32 %s1388_s21, 4  ;;  %s271_s22 = int_to_ptr.vmem [resolvable:$true] %s270_s22 }
  0x15   : > { %p1160_p11 = pneg %p257_p10  ;;  %314 = sbr.rel (%p257_p10) target bundleno = 2614 (0xa36), region = 44 }
  0x17   : > { %p1161_p12 = pnand %p1174_p9, %p1160_p11 }
  0x18   : > { %s268_s20 = sshll.u32 %s1867_s1, 4  ;;  %s269_s20 = int_to_ptr.hbm [resolvable:$true] %s268_s20 }
  0x19   : > { %1163 = dma.hbm_to_vmem [thread:$0]  (!%p1161_p12), %s269_s20, 16, %s271_s22, [#allocation4]  }
  0x1a   : > { %1361 = dma.done.wait (%p1174_p9), [#allocation4], 16  }
  0x1b   : > { %1363 = vsyncadd (%p1174_p9), [#allocation4], 4294967280  ;;  %p368_p13 = scmp.lt.s32.totalorder %s1460_s5, 1  ;;  %s1868_s0 = sld [smem:[#allocation13_spill]]  ;;  %vm396_vm0 = vcmask 261120   ;;  %v386_v6 = vlaneseq  ;;  %vm436_vm3 = vcmask 130048  }
  0x1c   : > { %s598_s21 = sld [smem:[#allocation2]]  ;;  %s1754_s25 = sand.u32 1, %s1378_s30  }
  0x1d   : > { %s1495_s23 = scalar_select %p368_p13, %s1460_s5, 1  ;;  %v1525_v7 = vshrl.u32 %v386_v6, 7  ;;  %v1527_v8 = vand.u32 127, %v386_v6 }
  0x1e   : > { %s361_s26 = scalar_lea.vmem [#allocation7], %s1754_s25  ;;  %s935_s13 = scalar_lea.hbm %s1859_s7, %s1460_s5 }
  0x1f   : > { %s1131_s24 = sshll.u32 %s1495_s23, 4  ;;  %v1530_v10 = vadd.s32 8, %v1525_v7  ;;  %vm391_vm1 = vcmp.eq.s32.totalorder %v1525_v7, %v1527_v8  ;;  %s380_s20 = scalar_lea.vmem %s1855_s3, %s1495_s23 }
  0x20   : > { %s377_s14 = scalar_lea.vmem %s1854_s2, %s1131_s24  ;;  %s937_s18 = sshll.u32 %s361_s26, 4  ;;  %s938_s18 = int_to_ptr.vmem [resolvable:$true] %s937_s18 }
  0x21   : > { %s372_s27 = scalar_lea.vmem %s1868_s0, %s1131_s24  ;;  %vm392_vm2 = vcmp.eq.s32.totalorder %v1530_v10, %v1527_v8  ;;  %s939_s19 = sshll.u32 %s935_s13, 4  ;;  %s940_s19 = int_to_ptr.hbm [resolvable:$true] %s939_s19 }
  0x22   : > { %v1503_v0 = vld [vmem:[%s372_s27] sm:$0xff]  ;;  %v1505_v1 = vld [vmem:[%s372_s27 + $0x8] sm:$0xff]  ;;  %s383_s22 = scalar_lea.vmem %s1856_s4, %s1495_s23  ;;  %s1274_s11 = sshra.s32 %s940_s19, 4  ;;  %s1275_s11 = int_to_ptr.hbm [resolvable:$true] %s1274_s11 }
  0x23   : > { %v426_v2 = vmul.f32 %v1503_v0, %v1503_v0  ;;  %1133 = vmatpush.xpose.msk.msra.mxu3 %vm396_vm0, %v1505_v1  ;;  %1118 = vmatpush.xpose.msk.msra.mxu0 %vm396_vm0, %v1505_v1  ;;  %v427_v4 = vmul.f32 %v1505_v1, %v1505_v1  ;;  %s1276_s0 = scalar_lea.hbm %s1275_s11, 1  ;;  %s1280_s28 = scalar_lea.hbm %s1859_s7, 2 }
  0x24   : > { %p1277_p0 = scmp.ne.s32.totalorder %s1275_s11, %s1276_s0  ;;  %p1281_p3 = scmp.lt.s32.totalorder %s1275_s11, %s1859_s7 }
  0x25   : > { %v428_v3 = vsel %vm396_vm0, %v426_v2, 0.0  ;;  %v431_v5 = vsel %vm396_vm0, %v427_v4, 0.0  ;;  %p1282_p4 = scmp.lt.s32.totalorder %s1280_s28, %s1276_s0 }
  0x26   : > { %429 = vadd.xlane.f32.xlu0 %v428_v3  ;;  %p1278_p1 = pnand %p1277_p0, %p1479_p5 }
  0x27   : > { %1134 = vmatpush.xpose.msk.msra.mxu3 %vm396_vm0, %v1503_v0  ;;  %1119 = vmatpush.xpose.msk.msra.mxu0 %vm396_vm0, %v1503_v0  ;;  %p1283_p7 = por %p1282_p4, %p1281_p3 }
  0x28   : > { %p1279_p2 = pneg %p1278_p1 }
  0x2a   : > { %1121 = vmatmul.msk.f32.vlgmr.msra.gmra.mxu3 %vm396_vm0, %v1505_v1  ;;  %1120 = vmatmul.msk.f32.vlgmr.msra.gmra.mxu0 %vm396_vm0, %v1503_v0  ;;  %p1284_p8 = pnand %p1283_p7, %p1279_p2 }
  0x2e   : > { %432 = vadd.xlane.f32.xlu0 %v431_v5 }
  0x99   : > { %v430_v9 = vpop.xlane.xlu0 %429 }
  0x9a   : > { %v434_v11 = vsel %vm391_vm1, %v430_v9, 0.0 }
  0x9b   : > { %v437_v14 = vsel %vm436_vm3, %v434_v11, 0.0 }
  0xa1   : > { %v433_v12 = vpop.xlane.xlu0 %432 }
  0xa2   : > { %v435_v13 = vsel %vm392_vm2, %v433_v12, 0.0 }
  0xa3   : > { %v438_v15 = vsel %vm436_vm3, %v435_v13, 0.0 }
  0xa4   : > { %v439_v16 = vadd.f32 %v438_v15, %v437_v14 }
  0xa6   : > { %v440_v17 = vrot.slane %v439_v16, 4 }
  0xa7   : > { %v420_v21 = vpop.f32.mrf.mxu0 }
  0xa8   : > { %v441_v18 = vadd.f32 %v440_v17, %v439_v16  ;;  %v448_v25 = vmul.f32 2.0, %v420_v21 }
  0xaa   : > { %v442_v19 = vrot.slane %v441_v18, 2 }
  0xac   : > { %v443_v20 = vadd.f32 %v442_v19, %v441_v18 }
  0xad   : > { %v423_v23 = vpop.f32.mrf.mxu3 }
  0xae   : > { %v444_v22 = vrot.slane %v443_v20, 1  ;;  %v449_v28 = vmul.f32 2.0, %v423_v23 }
  0xb0   : > { %v445_v24 = vadd.f32 %v444_v22, %v443_v20 }
  0xb2   : > { %v447_v26 = vadd.f32 %v445_v24, %v433_v12  ;;  %v446_v27 = vadd.f32 %v445_v24, %v430_v9  ;;  %v1389_v12 = vmov 0  }
  0xb3   : > { %1212 = vset.pattern.permute.xlu0 %v1389_v12  ;;  %1213 = vset.pattern.permute.xlu1 %v1389_v12 }
  0xb4   : > { %v450_v29 = vsub.f32 %v446_v27, %v448_v25  ;;  %v451_v31 = vsub.f32 %v447_v26, %v449_v28  ;;  %v532_v26 = vld [vmem:[%s377_s14] sm:$0xff] }
  0xb5   : > { %v534_v28 = vmul.f32 1e-06, %v532_v26 }
  0xb6   : > { %v452_v30 = vmax.f32 %v450_v29, 0.0  ;;  %v453_v34 = vmax.f32 %v451_v31, 0.0 }
  0xb8   : > { %v1547_v32 = vsel %vm391_vm1, 0.0, %v452_v30  ;;  %v1554_v35 = vsel %vm392_vm2, 0.0, %v453_v34  ;;  %v533_v34 = vld [vmem:[%s377_s14 + $0x8] sm:$0xff]  ;;  %s908_s14 = sand.u32 1, %s1460_s5  }
  0xb9   : > { %v468_v33 = vsel %vm436_vm3, %v1547_v32, inf  ;;  %v471_v36 = vsel %vm436_vm3, %v1554_v35, inf  ;;  %v456_v55 = vsel %vm436_vm3, %v1547_v32, -inf  ;;  %v457_v56 = vsel %vm436_vm3, %v1554_v35, -inf  ;;  %s1786_s24 = scalar_lea.sflag [#allocation8], %s908_s14 }
  0xba   : > { %469 = vmin.xlane.f32.xlu1 %v468_v33  ;;  %v458_v57 = vmax.f32 %v456_v55, %v457_v56 }
  0xbc   : > { %v459_v58 = vrot.slane %v458_v57, 4 }
  0xbe   : > { %v460_v59 = vmax.f32 %v458_v57, %v459_v58 }
  0xc0   : > { %v461_v63 = vrot.slane %v460_v59, 2 }
  0xc2   : > { %472 = vmin.xlane.f32.xlu1 %v471_v36  ;;  %v462_v2 = vmax.f32 %v460_v59, %v461_v63  ;;  %v535_v36 = vmul.f32 1e-06, %v533_v34 }
  0xc4   : > { %v463_v6 = vrot.slane %v462_v2, 1 }
  0xc6   : > { %v464_v9 = vmax.f32 %v462_v2, %v463_v6 }
  0xc8   : > { %v465_v11 = vsel %vm436_vm3, %v464_v9, -inf }
 0x12d   : > { %v470_v37 = vpop.xlane.xlu1 %469 }
 0x12e   : > { %vm476_vm4 = vcmp.eq.f32.partialorder %v1547_v32, %v470_v37 }
 0x12f   : > { %v478_v38 = vsel %vm476_vm4, 1e+30, %v1547_v32 }
 0x130   : > { %v480_v39 = vsel %vm436_vm3, %v478_v38, inf }
 0x131   : > { %481 = vmin.xlane.f32.xlu2 %v480_v39 }
 0x135   : > { %v473_v40 = vpop.xlane.xlu1 %472 }
 0x136   : > { %vm477_vm5 = vcmp.eq.f32.partialorder %v1554_v35, %v473_v40 }
 0x137   : > { %v479_v41 = vsel %vm477_vm5, 1e+30, %v1554_v35 }
 0x138   : > { %v483_v42 = vsel %vm436_vm3, %v479_v41, inf }
 0x139   : > { %484 = vmin.xlane.f32.xlu2 %v483_v42 }
 0x1a4   : > { %v482_v43 = vpop.xlane.xlu2 %481 }
 0x1a5   : > { %vm488_vm6 = vcmp.eq.f32.partialorder %v478_v38, %v482_v43  ;;  %v486_v13 = vadd.f32 %v482_v43, %v470_v37 }
 0x1a6   : > { %v490_v44 = vsel %vm488_vm6, 1e+30, %v478_v38 }
 0x1a7   : > { %v492_v45 = vsel %vm436_vm3, %v490_v44, inf }
 0x1a8   : > { %493 = vmin.xlane.f32.xlu0 %v492_v45 }
 0x1ac   : > { %v485_v46 = vpop.xlane.xlu2 %484 }
 0x1ad   : > { %vm489_vm7 = vcmp.eq.f32.partialorder %v479_v41, %v485_v46  ;;  %v487_v18 = vadd.f32 %v485_v46, %v473_v40 }
 0x1ae   : > { %v491_v47 = vsel %vm489_vm7, 1e+30, %v479_v41 }
 0x1af   : > { %v495_v48 = vsel %vm436_vm3, %v491_v47, inf }
 0x1b0   : > { %496 = vmin.xlane.f32.xlu1 %v495_v48 }
 0x21b   : > { %v494_v49 = vpop.xlane.xlu0 %493 }
 0x21c   : > { %vm500_vm8 = vcmp.eq.f32.partialorder %v490_v44, %v494_v49  ;;  %v498_v14 = vadd.f32 %v494_v49, %v486_v13 }
 0x21d   : > { %v502_v50 = vsel %vm500_vm8, 1e+30, %v490_v44 }
 0x21e   : > { %v504_v51 = vsel %vm436_vm3, %v502_v50, inf }
 0x21f   : > { %505 = vmin.xlane.f32.xlu2 %v504_v51 }
 0x223   : > { %v497_v52 = vpop.xlane.xlu1 %496 }
 0x224   : > { %vm501_vm9 = vcmp.eq.f32.partialorder %v491_v47, %v497_v52  ;;  %v499_v20 = vadd.f32 %v497_v52, %v487_v18  ;;  %v1594_v18 = vcvt.s32.f32 %v1527_v8 }
 0x225   : > { %v503_v53 = vsel %vm501_vm9, 1e+30, %v491_v47  ;;  %vm618_vm9 = vcmp.eq.s32.totalorder %v1527_v8, 0 }
 0x226   : > { %v507_v54 = vsel %vm436_vm3, %v503_v53, inf }
 0x227   : > { %508 = vmin.xlane.f32.xlu0 %v507_v54 }
 0x292   : > { %v506_v60 = vpop.xlane.xlu2 %505 }
 0x293   : > { %vm512_vm10 = vcmp.eq.f32.partialorder %v502_v50, %v506_v60  ;;  %v510_v15 = vadd.f32 %v506_v60, %v498_v14 }
 0x294   : > { %v514_v61 = vsel %vm512_vm10, 1e+30, %v502_v50 }
 0x295   : > { %v516_v62 = vsel %vm436_vm3, %v514_v61, inf }
 0x296   : > { %517 = vmin.xlane.f32.xlu1 %v516_v62 }
 0x29a   : > { %v509_v3 = vpop.xlane.xlu0 %508 }
 0x29b   : > { %vm513_vm11 = vcmp.eq.f32.partialorder %v503_v53, %v509_v3  ;;  %v511_v22 = vadd.f32 %v509_v3, %v499_v20 }
 0x29c   : > { %v515_v4 = vsel %vm513_vm11, 1e+30, %v503_v53  ;;  %vm641_vm11 = vcmp.eq.s32.totalorder %v1527_v8, 1 }
 0x29d   : > { %v519_v5 = vsel %vm436_vm3, %v515_v4, inf }
 0x29e   : > { %520 = vmin.xlane.f32.xlu2 %v519_v5 }
 0x2a6   : > { %466 = vmax.xlane.f32.xlu2 %v465_v11 }
 0x309   : > { %v518_v16 = vpop.xlane.xlu1 %517 }
 0x30a   : > { %v522_v17 = vadd.f32 %v518_v16, %v510_v15 }
 0x30c   : > { %v524_v19 = vmul.f32 0.00625, %v522_v17 }
 0x30e   : > { %v526_v21 = vsub.f32 0.0, %v524_v19 }
 0x310   : > { %v528_v23 = vmul.f32 1.442695, %v526_v21 }
 0x311   : > { %v521_v24 = vpop.xlane.xlu2 %520 }
 0x312   : > { %1216 = vpow2.f32 %v528_v23  ;;  %v523_v25 = vadd.f32 %v521_v24, %v511_v22 }
 0x314   : > { %v525_v27 = vmul.f32 0.00625, %v523_v25 }
 0x316   : > { %v527_v29 = vsub.f32 0.0, %v525_v27 }
 0x318   : > { %v1217_v30 = vpop.eup %1216  ;;  %v530_v31 = vmul.f32 1.442695, %v527_v29 }
 0x319   : > { %v536_v33 = vadd.f32 %v1217_v30, %v534_v28  ;;  %v467_v52 = vpop.xlane.xlu2 %466 }
 0x31a   : > { %1218 = vpow2.f32 %v530_v31 }
 0x31b   : > { %540 = vperm.xlu0 %1212, %v536_v33  }
 0x320   : > { %v1219_v37 = vpop.eup %1218 }
 0x321   : > { %v537_v38 = vadd.f32 %v1219_v37, %v535_v36 }
 0x323   : > { %545 = vperm.xlu1 %1213, %v537_v38  }
 0x38d   : > { %v541_v39 = vpop.permute.xlu0 %540 }
 0x38e   : > { %v548_v40 = vsel %vm391_vm1, %v541_v39, 0.0 }
 0x38f   : > { %v550_v43 = vsel %vm436_vm3, %v548_v40, 0.0 }
 0x395   : > { %v546_v41 = vpop.permute.xlu1 %545 }
 0x396   : > { %v549_v42 = vsel %vm392_vm2, %v546_v41, 0.0 }
 0x397   : > { %v551_v44 = vsel %vm436_vm3, %v549_v42, 0.0  ;;  %v1620_v42 = vcvt.s32.f32 %v1530_v10 }
 0x398   : > { %v552_v45 = vadd.f32 %v551_v44, %v550_v43  ;;  %v1623_v43 = vcvt.s32.f32 %v1525_v7  ;;  %v1390_v44 = vmov 0.0  }
 0x39a   : > { %v553_v46 = vrot.slane %v552_v45, 4 }
 0x39c   : > { %v554_v47 = vadd.f32 %v553_v46, %v552_v45 }
 0x39e   : > { %v555_v48 = vrot.slane %v554_v47, 2 }
 0x3a0   : > { %v556_v49 = vadd.f32 %v555_v48, %v554_v47 }
 0x3a2   : > { %v557_v50 = vrot.slane %v556_v49, 1 }
 0x3a4   : > { %v558_v51 = vadd.f32 %v557_v50, %v556_v49 }
 0x3a6   : > { %vm559_vm12 = vcmp.gt.f32.partialorder %v541_v39, %v558_v51  ;;  %vm560_vm13 = vcmp.gt.f32.partialorder %v546_v41, %v558_v51 }
 0x3a7   : > { %v561_v53 = vsel %vm559_vm12, %v1547_v32, %v467_v52  ;;  %v562_v54 = vsel %vm560_vm13, %v1554_v35, %v467_v52 }
 0x3a8   : > { %v563_v55 = vsel %vm436_vm3, %v561_v53, inf  ;;  %v564_v56 = vsel %vm436_vm3, %v562_v54, inf }
 0x3a9   : > { %v565_v57 = vmin.f32 %v563_v55, %v564_v56 }
 0x3ab   : > { %v566_v58 = vrot.slane %v565_v57, 4 }
 0x3ad   : > { %v567_v59 = vmin.f32 %v565_v57, %v566_v58 }
 0x3af   : > { %v568_v60 = vrot.slane %v567_v59, 2 }
 0x3b1   : > { %v569_v61 = vmin.f32 %v567_v59, %v568_v60  ;;  %v1214_v60 = vld [vmem:[#allocation3] ss:$0 sm:$0xff] }
 0x3b3   : > { %v570_v62 = vrot.slane %v569_v61, 1 }
 0x3b5   : > { %v571_v63 = vmin.f32 %v569_v61, %v570_v62  ;;  %v590_v61 = vmul.f32 %v1214_v60, %v1503_v0 }
 0x3b7   : > { %1220 = vrsqrt.f32 %v571_v63  ;;  %vm579_vm14 = vcmp.eq.f32.partialorder %v571_v63, inf  ;;  %v582_v12 = vand.u32 2147483648, %v571_v63  ;;  %vm581_vm15 = vcmp.eq.f32.partialorder %v571_v63, 0.0 }
 0x3b8   : > { %v592_v62 = vsel %vm396_vm0, %v590_v61, 0.0 }
 0x3bd   : > { %v1221_v2 = vpop.eup %1220 }
 0x3be   : > { %v573_v3 = vmul.f32 %v1221_v2, %v571_v63 }
 0x3c0   : > { %v574_v4 = vmul.f32 %v1221_v2, %v573_v3 }
 0x3c2   : > { %v575_v5 = vmul.f32 0.5, %v574_v4 }
 0x3c4   : > { %v576_v6 = vsub.f32 1.5, %v575_v5 }
 0x3c6   : > { %v577_v9 = vmul.f32 %v1221_v2, %v576_v6 }
 0x3c8   : > { %v578_v11 = vmul.f32 %v577_v9, %v571_v63 }
 0x3ca   : > { %v580_v13 = vsel %vm579_vm14, %v571_v63, %v578_v11 }
 0x3cb   : > { %v583_v14 = vsel %vm581_vm15, %v582_v12, %v580_v13  ;;  %vm664_vm15 = vcmp.eq.s32.totalorder %v1527_v8, 2 }
 0x3cc   : > { %v584_v15 = vmul.f32 0.17677669, %v583_v14 }
 0x3ce   : > { %v585_v16 = vmul.f32 %v584_v15, %v558_v51 }
 0x3d0   : > { %v606_v17 = vsel %vm436_vm3, %v585_v16, -inf }
 0x3d1   : > { %607 = vmax.xlane.f32.xlu2 %v606_v17  ;;  %v599_v17 = vstv %s598_s21 }
 0x444   : > { %v608_v19 = vpop.xlane.xlu2 %607 }
 0x445   : > { %vm609_vm1 = vcmp.eq.f32.partialorder %v585_v16, %v608_v19 }
 0x446   : > { %v610_v20 = vsel %vm609_vm1, %v1594_v18, 16.0 }
 0x447   : > { %v611_v21 = vsel %vm436_vm3, %v610_v20, inf }
 0x448   : > { %612 = vmin.xlane.f32.xlu2 %v611_v21 }
 0x4bb   : > { %v1598_v22 = vpop.xlane.xlu2 %612 }
 0x4bc   : > { %vm614_vm2 = vcmp.eq.f32.partialorder %v1594_v18, %v1598_v22  ;;  %vm617_vm10 = vcmp.eq.f32.partialorder %v1620_v42, %v1598_v22 }
 0x4bd   : > { %v615_v23 = vsel %vm614_vm2, -1e+30, %v585_v16  ;;  %vm624_vm14 = vmand %vm617_vm10, %vm618_vm9  ;;  %vm616_vm2 = vcmp.eq.f32.partialorder %v1623_v43, %v1598_v22 }
 0x4be   : > { %v629_v24 = vsel %vm436_vm3, %v615_v23, -inf  ;;  %v626_v48 = vsel %vm624_vm14, 1.0, %v1390_v44 }
 0x4bf   : > { %630 = vmax.xlane.f32.xlu2 %v629_v24 }
 0x532   : > { %v631_v25 = vpop.xlane.xlu2 %630 }
 0x533   : > { %vm632_vm4 = vcmp.eq.f32.partialorder %v615_v23, %v631_v25 }
 0x534   : > { %v633_v26 = vsel %vm632_vm4, %v1594_v18, 16.0 }
 0x535   : > { %v634_v27 = vsel %vm436_vm3, %v633_v26, inf }
 0x536   : > { %635 = vmin.xlane.f32.xlu1 %v634_v27 }
 0x53e   : > { %593 = vadd.xlane.f32.xlu1 %v592_v62 }
 0x5a9   : > { %v1605_v28 = vpop.xlane.xlu1 %635 }
 0x5aa   : > { %vm637_vm5 = vcmp.eq.f32.partialorder %v1594_v18, %v1605_v28  ;;  %vm1861_vm12 = vcmp.eq.f32.partialorder %v1620_v42, %v1605_v28  ;;  %vm639_vm13 = vcmp.eq.f32.partialorder %v1623_v43, %v1605_v28 }
 0x5ab   : > { %v638_v29 = vsel %vm637_vm5, -1e+30, %v615_v23  ;;  %vm647_vm4 = vmand %vm1861_vm12, %vm641_vm11 }
 0x5ac   : > { %v652_v30 = vsel %vm436_vm3, %v638_v29, -inf  ;;  %vm646_vm5 = vmand %vm639_vm13, %vm641_vm11  ;;  %v649_v45 = vsel %vm647_vm4, 1.0, %v1390_v44  ;;  %vm685_vm11 = vcmp.eq.s32.totalorder %v1527_v8, 3 }
 0x5ad   : > { %653 = vmax.xlane.f32.xlu2 %v652_v30  ;;  %v648_v46 = vsel %vm646_vm5, 1.0, %v1390_v44  ;;  %v651_v50 = vadd.f32 %v649_v45, %v626_v48  ;;  %vm728_vm5 = vcmask 64512   ;;  %v1717_v45 = vld [vmem:[%s380_s20] ss:$0 sm:$0xff] }
 0x5b1   : > { %v594_v16 = vpop.xlane.xlu1 %593 }
 0x5b2   : > { %v600_v20 = vadd.f32 %v599_v17, %v594_v16 }
 0x5b4   : > { %v602_v26 = vmul.f32 1.442695, %v600_v20 }
 0x5b6   : > { %1222 = vpow2.f32 %v602_v26 }
 0x5bc   : > { %v1719_v48 = vpop.eup %1222 }
 0x620   : > { %v654_v31 = vpop.xlane.xlu2 %653 }
 0x621   : > { %vm655_vm6 = vcmp.eq.f32.partialorder %v638_v29, %v654_v31 }
 0x622   : > { %v656_v33 = vsel %vm655_vm6, %v1594_v18, 16.0 }
 0x623   : > { %v657_v34 = vsel %vm436_vm3, %v656_v33, inf }
 0x624   : > { %658 = vmin.xlane.f32.xlu0 %v657_v34 }
 0x697   : > { %v1612_v36 = vpop.xlane.xlu0 %658 }
 0x698   : > { %vm660_vm7 = vcmp.eq.f32.partialorder %v1594_v18, %v1612_v36  ;;  %vm663_vm1 = vcmp.eq.f32.partialorder %v1620_v42, %v1612_v36  ;;  %vm662_vm6 = vcmp.eq.f32.partialorder %v1623_v43, %v1612_v36 }
 0x699   : > { %v661_v37 = vsel %vm660_vm7, -1e+30, %v638_v29  ;;  %vm670_vm7 = vmand %vm663_vm1, %vm664_vm15 }
 0x69a   : > { %v675_v38 = vsel %vm436_vm3, %v661_v37, -inf  ;;  %vm669_vm12 = vmand %vm662_vm6, %vm664_vm15  ;;  %v672_v49 = vsel %vm670_vm7, 1.0, %v1390_v44 }
 0x69b   : > { %676 = vmax.xlane.f32.xlu2 %v675_v38  ;;  %v671_v52 = vsel %vm669_vm12, 1.0, %v1390_v44  ;;  %v674_v53 = vadd.f32 %v672_v49, %v651_v50  ;;  %vm725_vm12 = vcmp.lt.s32.totalorder %v1527_v8, 4 }
 0x70e   : > { %v677_v39 = vpop.xlane.xlu2 %676 }
 0x70f   : > { %vm678_vm8 = vcmp.eq.f32.partialorder %v661_v37, %v677_v39 }
 0x710   : > { %v679_v40 = vsel %vm678_vm8, %v1594_v18, 16.0  ;;  %vm623_vm8 = vmand %vm616_vm2, %vm618_vm9 }
 0x711   : > { %v680_v41 = vsel %vm436_vm3, %v679_v40, inf  ;;  %v625_v51 = vsel %vm623_vm8, 1.0, %v1390_v44 }
 0x712   : > { %681 = vmin.xlane.f32.xlu2 %v680_v41  ;;  %v650_v54 = vadd.f32 %v648_v46, %v625_v51 }
 0x714   : > { %v673_v58 = vadd.f32 %v671_v52, %v650_v54 }
 0x785   : > { %v1661_v47 = vpop.xlane.xlu2 %681 }
 0x786   : > { %vm683_vm9 = vcmp.eq.f32.partialorder %v1623_v43, %v1661_v47  ;;  %vm684_vm4 = vcmp.eq.f32.partialorder %v1620_v42, %v1661_v47 }
 0x787   : > { %vm690_vm15 = vmand %vm683_vm9, %vm685_vm11 }
 0x788   : > { %vm691_vm14 = vmand %vm684_vm4, %vm685_vm11  ;;  %v692_v56 = vsel %vm690_vm15, 1.0, %v1390_v44 }
 0x789   : > { %v693_v55 = vsel %vm691_vm14, 1.0, %v1390_v44  ;;  %v694_v59 = vadd.f32 %v692_v56, %v673_v58 }
 0x78a   : > { %v695_v57 = vadd.f32 %v693_v55, %v674_v53 }
 0x78c   : > { %716 = vmatpush.msra.mxu1 %v695_v57 }
 0x78e   : > { %717 = vmatpush.msra.mxu1 %v694_v59 }
 0x78f   : > { %1122 = vmatmul.msk.f32.vlgmr.msra.gmra.mxu1 %vm436_vm3, %v1547_v32 }
 0x797   : > { %1123 = vmatmul.msk.f32.gmra.mxu1 %vm436_vm3, %v1554_v35  ;;  %v591_v35 = vmul.f32 %v1214_v60, %v1505_v1 }
 0x799   : > { %v595_v6 = vsel %vm396_vm0, %v591_v35, 0.0 }
 0x80c   : > { %v719_v63 = vpop.f32.mrf.mxu1 }
 0x80d   : > { %v726_v2 = vsel %vm725_vm12, %v719_v63, 1e+30 }
 0x80e   : > { %v729_v3 = vsel %vm728_vm5, %v726_v2, inf }
 0x80f   : > { %730 = vmin.xlane.f32.xlu2 %v729_v3 }
 0x814   : > { %v722_v4 = vpop.f32.mrf.mxu1 }
 0x815   : > { %v727_v32 = vsel %vm725_vm12, %v722_v4, 1e+30 }
 0x816   : > { %v732_v5 = vsel %vm728_vm5, %v727_v32, inf }
 0x817   : > { %733 = vmin.xlane.f32.xlu2 %v732_v5 }
 0x81f   : > { %596 = vadd.xlane.f32.xlu2 %v595_v6 }
 0x882   : > { %v731_v9 = vpop.xlane.xlu2 %730 }
 0x883   : > { %vm735_vm7 = vcmp.eq.f32.partialorder %v726_v2, %v731_v9 }
 0x884   : > { %v737_v11 = vsel %vm735_vm7, %v1594_v18, 8.0 }
 0x885   : > { %v739_v12 = vsel %vm728_vm5, %v737_v11, inf }
 0x886   : > { %740 = vmin.xlane.f32.xlu1 %v739_v12 }
 0x88a   : > { %v734_v13 = vpop.xlane.xlu2 %733 }
 0x88b   : > { %vm736_vm8 = vcmp.eq.f32.partialorder %v727_v32, %v734_v13 }
 0x88c   : > { %v738_v14 = vsel %vm736_vm8, %v1594_v18, 8.0 }
 0x88d   : > { %v742_v15 = vsel %vm728_vm5, %v738_v14, inf }
 0x88e   : > { %743 = vmin.xlane.f32.xlu2 %v742_v15 }
 0x892   : > { %v597_v19 = vpop.xlane.xlu2 %596 }
 0x893   : > { %v601_v27 = vadd.f32 %v599_v17, %v597_v19 }
 0x895   : > { %v604_v31 = vmul.f32 1.442695, %v601_v27 }
 0x897   : > { %1224 = vpow2.f32 %v604_v31 }
 0x89d   : > { %v1742_v54 = vpop.eup %1224 }
 0x8f9   : > { %v741_v21 = vpop.xlane.xlu1 %740 }
 0x8fa   : > { %vm1135_vm11 = vcmp.lt.s32.totalorder %v741_v21, 0  ;;  %v1136_v23 = vceil.f32 %v741_v21  ;;  %v1137_v24 = vfloor.f32 %v741_v21 }
 0x8fc   : > { %v1138_v25 = vsel %vm1135_vm11, %v1136_v23, %v1137_v24 }
 0x8fd   : > { %v1139_v29 = vcvt.f32.s32 %v1138_v25 }
 0x8ff   : > { %v747_v18 = vsel %vm616_vm2, 0, %v1139_v29 }
 0x900   : > { %v749_v30 = vsel %vm639_vm13, 1, %v747_v18  ;;  %vm1869_vm13 = vcmp.eq.f32.partialorder %v1620_v42, %v1605_v28 }
 0x901   : > { %v744_v33 = vpop.xlane.xlu2 %743  ;;  %v751_v34 = vsel %vm662_vm6, 2, %v749_v30  ;;  %vm871_vm6 = vcmp.eq.s32.totalorder %v1525_v7, %v1717_v45 }
 0x902   : > { %vm1140_vm15 = vcmp.lt.s32.totalorder %v744_v33, 0  ;;  %v1141_v37 = vceil.f32 %v744_v33  ;;  %v1142_v38 = vfloor.f32 %v744_v33  ;;  %v753_v39 = vsel %vm683_vm9, 3, %v751_v34 }
 0x903   : > { %vm755_vm2 = vcmp.eq.s32.totalorder %v1527_v8, %v753_v39  ;;  %v873_v49 = vcvt.s32.f32 %v753_v39  ;;  %vm872_vm9 = vcmp.eq.s32.totalorder %v1530_v10, %v1717_v45 }
 0x904   : > { %v1143_v40 = vsel %vm1140_vm15, %v1141_v37, %v1142_v38  ;;  %v1124_v41 = vsel %vm755_vm2, 1.0, %v1390_v44 }
 0x905   : > { %v1144_v46 = vcvt.f32.s32 %v1143_v40  ;;  %813 = vxpose.xlu2.b32.start [1/2] (short) (narrow) %v1124_v41, 8  ;;  %v761_v22 = vmul.f32 %v1719_v48, %v1124_v41  ;;  %v875_v53 = vsel %vm871_vm6, %v873_v49, 0.0 }
 0x907   : > { %v748_v43 = vsel %vm617_vm10, 0, %v1144_v46  ;;  %v763_v56 = vsel %vm728_vm5, %v761_v22, 0.0 }
 0x908   : > { %v750_v50 = vsel %vm1869_vm13, 1, %v748_v43 }
 0x909   : > { %v752_v51 = vsel %vm663_vm1, 2, %v750_v50 }
 0x90a   : > { %v754_v52 = vsel %vm684_vm4, 3, %v752_v51  ;;  %vm898_vm4 = vcmask 122880  }
 0x90b   : > { %vm756_vm10 = vcmp.eq.s32.totalorder %v1527_v8, %v754_v52  ;;  %v874_v28 = vcvt.s32.f32 %v754_v52  ;;  %v877_v8 = vsel %vm436_vm3, %v875_v53, 0.0 }
 0x90c   : > { %v1125_v36 = vsel %vm756_vm10, 1.0, %v1390_v44 }
 0x90d   : > { %v762_v55 = vmul.f32 %v1742_v54, %v1125_v36  ;;  %814 = vxpose.xlu2.b32.end [2/2] (short) (narrow) %v1125_v36, 8  ;;  %v876_v42 = vsel %vm872_vm9, %v874_v28, 0.0 }
 0x90e   : > { %v878_v47 = vsel %vm436_vm3, %v876_v42, 0.0 }
 0x90f   : > { %v764_v57 = vsel %vm728_vm5, %v762_v55, 0.0  ;;  %v879_v58 = vadd.f32 %v878_v47, %v877_v8 }
 0x910   : > { %v765_v59 = vadd.f32 %v764_v57, %v763_v56 }
 0x911   : > { %v880_v60 = vrot.slane %v879_v58, 4 }
 0x912   : > { %v766_v44 = vrot.slane %v765_v59, 4 }
 0x913   : > { %v881_v61 = vadd.f32 %v880_v60, %v879_v58 }
 0x914   : > { %v767_v62 = vadd.f32 %v766_v44, %v765_v59 }
 0x915   : > { %v882_v63 = vrot.slane %v881_v61, 2 }
 0x916   : > { %v768_v2 = vrot.slane %v767_v62, 2 }
 0x917   : > { %v883_v3 = vadd.f32 %v882_v63, %v881_v61 }
 0x918   : > { %v769_v4 = vadd.f32 %v768_v2, %v767_v62 }
 0x919   : > { %v884_v32 = vrot.slane %v883_v3, 1 }
 0x91a   : > { %v770_v5 = vrot.slane %v769_v4, 1 }
 0x91b   : > { %v885_v35 = vadd.f32 %v884_v32, %v883_v3 }
 0x91c   : > { %v771_v6 = vadd.f32 %v770_v5, %v769_v4 }
 0x91d   : > { %vm1145_vm1 = vcmp.lt.s32.totalorder %v885_v35, 0  ;;  %v1146_v9 = vceil.f32 %v885_v35  ;;  %v1147_v11 = vfloor.f32 %v885_v35 }
 0x91e   : > { %v772_v12 = vadd.f32 1e-06, %v771_v6 }
 0x91f   : > { %v1148_v13 = vsel %vm1145_vm1, %v1146_v9, %v1147_v11 }
 0x920   : > { %v774_v14 = vmul.f32 %v1125_v36, %v772_v12  ;;  %v773_v15 = vmul.f32 %v1124_v41, %v772_v12  ;;  %v1149_v16 = vcvt.f32.s32 %v1148_v13 }
 0x922   : > { %v778_v17 = vsel %vm728_vm5, %v774_v14, 0.0  ;;  %v775_v19 = vsel %vm728_vm5, %v773_v15, 0.0  ;;  %899 = vst.msk [vmem:[%s361_s26] sm:$0x1] %vm898_vm4, %v1149_v16 }
 0x923   : > { %779 = vadd.xlane.f32.xlu0 %v778_v17  ;;  %776 = vadd.xlane.f32.xlu1 %v775_v19 }
 0x996   : > { %v780_v20 = vpop.xlane.xlu0 %779  ;;  %v777_v21 = vpop.xlane.xlu1 %776 }
 0x997   : > { %1226 = vrcp.f32 %v780_v20  ;;  %v807_v29 = vand.u32 2147483648, %v780_v20  ;;  %v792_v31 = vand.u32 2147483648, %v777_v21  ;;  %v805_v33 = vand.u32 2147483647, %v780_v20 }
 0x998   : > { %1228 = vrcp.f32 %v777_v21  ;;  %v790_v37 = vand.u32 2147483647, %v777_v21  ;;  %vm801_vm5 = vweird.f32 %v780_v20  ;;  %vm786_vm8 = vweird.f32 %v777_v21 }
 0x999   : > { %v808_v39 = vor.u32 1.1754944e-38, %v807_v29  ;;  %v793_v41 = vor.u32 1.1754944e-38, %v792_v31  ;;  %vm806_vm15 = vcmp.eq.f32.partialorder %v805_v33, 8.507059e+37 }
 0x99a   : > { %vm791_vm2 = vcmp.eq.f32.partialorder %v790_v37, 8.507059e+37 }
 0x99d   : > { %v1227_v23 = vpop.eup %1226 }
 0x99e   : > { %v1229_v24 = vpop.eup %1228  ;;  %v797_v25 = vmul.f32 %v1227_v23, %v780_v20  ;;  %vm802_vm14 = vweird.f32 %v1227_v23 }
 0x99f   : > { %v782_v26 = vmul.f32 %v1229_v24, %v777_v21  ;;  %vm787_vm12 = vweird.f32 %v1229_v24  ;;  %vm803_vm7 = vmor %vm801_vm5, %vm802_vm14 }
 0x9a0   : > { %v798_v27 = vsub.f32 1.0, %v797_v25  ;;  %vm788_vm11 = vmor %vm786_vm8, %vm787_vm12 }
 0x9a1   : > { %v783_v18 = vsub.f32 1.0, %v782_v26 }
 0x9a2   : > { %v799_v30 = vmul.f32 %v1227_v23, %v798_v27 }
 0x9a3   : > { %v784_v34 = vmul.f32 %v1229_v24, %v783_v18 }
 0x9a4   : > { %v800_v38 = vadd.f32 %v1227_v23, %v799_v30 }
 0x9a5   : > { %v785_v40 = vadd.f32 %v1229_v24, %v784_v34 }
 0x9a6   : > { %v804_v46 = vsel %vm803_vm7, %v1227_v23, %v800_v38 }
 0x9a7   : > { %v809_v49 = vsel %vm806_vm15, %v808_v39, %v804_v46  ;;  %v789_v43 = vsel %vm788_vm11, %v1229_v24, %v785_v40 }
 0x9a8   : > { %v810_v50 = vmul.f32 %v1742_v54, %v809_v49  ;;  %v794_v51 = vsel %vm791_vm2, %v793_v41, %v789_v43  ;;  %v829_v54 = vpop.trf.xlu2 }
 0x9a9   : > { %v795_v52 = vmul.f32 %v1719_v48, %v794_v51 }
 0x9aa   : > { %v812_v22 = vmul.f32 %v810_v50, %v1505_v1  ;;  %v887_v28 = vsel %vm872_vm9, %v810_v50, 0.0 }
 0x9ab   : > { %v889_v53 = vsel %vm436_vm3, %v887_v28, 0.0  ;;  %v886_v36 = vsel %vm871_vm6, %v795_v52, 0.0  ;;  %v811_v55 = vmul.f32 %v795_v52, %v1503_v0 }
 0x9ac   : > { %862 = vmatpush.msra.mxu2 %v812_v22  ;;  %v888_v48 = vsel %vm436_vm3, %v886_v36, 0.0 }
 0x9ad   : > { %v890_v42 = vadd.f32 %v889_v53, %v888_v48 }
 0x9ae   : > { %863 = vmatpush.msra.mxu2 %v811_v55 }
 0x9af   : > { %v891_v1 = vrot.slane %v890_v42, 4  ;;  %1126 = vmatmul.msk.f32.vlgmr.msra.gmra.mxu2 %vm436_vm3, %v829_v54 }
 0x9b1   : > { %v892_v10 = vadd.f32 %v891_v1, %v890_v42 }
 0x9b3   : > { %v893_v7 = vrot.slane %v892_v10, 2 }
 0x9b5   : > { %v894_v0 = vadd.f32 %v893_v7, %v892_v10 }
 0x9b6   : > { %1287 = shalt.err (!%p1284_p8)
}
 0x9b7   : > { %1155 = dma.vmem_to_hbm [thread:$0]  (%p1479_p5), %s938_s18, 16, %s940_s19, %s1786_s24   ;;  %v895_v45 = vrot.slane %v894_v0, 1  ;;  %v900_v47 = vld [vmem:[%s383_s22] sm:$0x1] }
 0x9b8   : > { %s948_s20 = scalar_lea.hbm %s1860_s8, %s1460_s5  ;;  %s367_s1 = scalar_lea.vmem [#allocation9], %s1754_s25 }
 0x9b9   : > { %v896_v8 = vadd.f32 %v895_v45, %v894_v0  ;;  %s950_s11 = sshll.u32 %s367_s1, 4  ;;  %s952_s0 = sshll.u32 %s948_s20, 4  ;;  %s951_s11 = int_to_ptr.vmem [resolvable:$true] %s950_s11  ;;  %s953_s0 = int_to_ptr.hbm [resolvable:$true] %s952_s0 }
 0x9ba   : > { %s1302_s21 = sshra.s32 %s953_s0, 4  ;;  %s1308_s22 = scalar_lea.hbm %s1860_s8, 2  ;;  %s1303_s21 = int_to_ptr.hbm [resolvable:$true] %s1302_s21 }
 0x9bb   : > { %v901_v56 = vmul.f32 %v900_v47, %v896_v8  ;;  %s1304_s27 = scalar_lea.hbm %s1303_s21, 1  ;;  %p1309_p12 = scmp.lt.s32.totalorder %s1303_s21, %s1860_s8 }
 0x9bc   : > { %p1305_p9 = scmp.ne.s32.totalorder %s1303_s21, %s1304_s27  ;;  %p1310_p13 = scmp.lt.s32.totalorder %s1308_s22, %s1304_s27 }
 0x9bd   : > { %902 = vst.msk [vmem:[%s367_s1] sm:$0x1] %vm898_vm4, %v901_v56 }
 0x9be   : > { %p1306_p10 = pnand %p1305_p9, %p1479_p5  ;;  %p1311_p0 = por %p1310_p13, %p1309_p12 }
 0x9c0   : > { %p1307_p11 = pneg %p1306_p10 }
 0x9c2   : > { %p1312_p1 = pnand %p1311_p0, %p1307_p11 }
 0x9c4   : > { %1315 = shalt.err (!%p1312_p1)
}
 0x9c5   : > { %1156 = dma.vmem_to_hbm [thread:$0]  (%p1479_p5), %s951_s11, 16, %s953_s0, %s1786_s24  }
 0x9c6   : > { %s1113_s13 = sshll.u32 %s1754_s25, 3  ;;  %s1128_s23 = sshll.u32 %s1460_s5, 3 }
 0x9c7   : > { %s922_s1 = scalar_lea.hbm %s1858_s6, %s1128_s23  ;;  %s355_s18 = scalar_lea.vmem [#allocation6], %s1113_s13 }
 0x9c8   : > { %s924_s21 = sshll.u32 %s355_s18, 4  ;;  %s926_s27 = sshll.u32 %s922_s1, 4  ;;  %s925_s21 = int_to_ptr.vmem [resolvable:$true] %s924_s21  ;;  %s927_s27 = int_to_ptr.hbm [resolvable:$true] %s926_s27 }
 0x9c9   : > { %s904_s19 = scalar_lea.sflag [#allocation5], %s1754_s25  ;;  %s1330_s22 = sshra.s32 %s927_s27, 4  ;;  %s1331_s22 = int_to_ptr.hbm [resolvable:$true] %s1330_s22 }
 0x9ca   : > { %s1332_s26 = scalar_lea.hbm %s1331_s22, 8  ;;  %s1336_s11 = scalar_lea.hbm %s1858_s6, 16 }
 0x9cb   : > { %p1333_p2 = scmp.ne.s32.totalorder %s1331_s22, %s1332_s26  ;;  %p1337_p7 = scmp.lt.s32.totalorder %s1331_s22, %s1858_s6 }
 0x9cc   : > { %p1338_p8 = scmp.lt.s32.totalorder %s1336_s11, %s1332_s26 }
 0x9cd   : > { %p1334_p3 = pnand %p1333_p2, %p1479_p5 }
 0x9ce   : > { %p1339_p9 = por %p1338_p8, %p1337_p7 }
 0x9cf   : > { %p1335_p4 = pneg %p1334_p3 }
 0x9d1   : > { %p1340_p10 = pnand %p1339_p9, %p1335_p4 }
 0xa32   : > { %v865_v57 = vpop.f32.mrf.mxu2 }
 0xa33   : > { %868 = vst.msk [vmem:[%s355_s18] sm:$0xff] %vm396_vm0, %v865_v57 }
 0xa34   : > { %1343 = shalt.err (!%p1340_p10)
}
 0xa35   : > { %1154 = dma.vmem_to_hbm [thread:$0]  (%p1479_p5), %s925_s21, 128, %s927_s27, %s904_s19  }
 0xa36 PF: > { %p1176_p11 = scmp.ge.s32.totalorder %s1386_s10, 2  ;;  %s964_s25 = sand.u32 1, %s1374_s29  }
 0xa37   : > { %s965_s13 = scalar_lea.sflag [#allocation5], %s964_s25 }
 0xa38   : > { %p1165_p12 = pnand %p1176_p11, %p1483_p6 }
 0xa3a   : > { %p1166_p13 = pneg %p1165_p12 }
 0xa3c   : > { %1365 = dma.done.wait (%p1166_p13), %s965_s13, 128  }
 0xa3d   : > { %1367 = vsyncadd (%p1166_p13), %s965_s13, 4294967168  ;;  %s1870_s23 = sadd.s32 4294967294, %s1386_s10  }
 0xa3e   : > { %s974_s14 = sand.u32 1, %s1870_s23  }
 0xa3f   : > { %s975_s20 = scalar_lea.sflag [#allocation8], %s974_s14 }
 0xa40   : > { %1369 = dma.done.wait (%p1166_p13), %s975_s20, 32  }
 0xa41   : > { %1371 = vsyncadd (%p1166_p13), %s975_s20, 4294967264  ;;  %p24_p5 = scmp.ge.s32.totalorder %s1464_s12, 4   ;;  %s1871_s29 = smov %s1378_s30 }
 0xa42   : > { %s1872_s30 = smov %s1382_s9  ;;  %s1873_s9 = smov %s1477_s15 }
 0xa43   : > { %s1874_s10 = smov %s1464_s12  ;;  %26 = sbr.rel (!%p24_p5) target bundleno = 10 (0xa), region = 125 }
 0xa48   :  { %989 = vsyncpa [#allocation4], 1 }
 0xa49   :  { %991 = vsyncpa [#allocation4 + $0x1], 1 }
 0xa4a   :  { %992 = vsyncpa [#allocation5], 1 }
 0xa4b   :  { %994 = vsyncpa [#allocation5 + $0x1], 1 }
 0xa4c   :  { %995 = vsyncpa [#allocation8], 1 }
 0xa4d   :  { %997 = vsyncpa [#allocation8 + $0x1], 1 }

</bundles_post_ra>
